<compile_context>
chip_gen: v7x
topology: tpu7x:2x2x1
jax: 0.10.0
libtpu: 0.0.40
codegen_flags: <defaults>
</compile_context>

<pallas_src>
import jax
import jax.numpy as jnp
from jax.experimental import pallas as pl
from jax.experimental.pallas import tpu as pltpu

# ----------------------------- static geometry -----------------------------
H1, W1 = 28, 28                        # conv1 spatial
H2, W2 = 14, 14                        # conv2 spatial (after pool1)
H3, W3 = 7, 7                          # after pool2
S1, S2, S3 = H1 * W1, H2 * W2, H3 * W3     # 784, 196, 49
C1, C2, NCLS = 8, 16, 10
NTAP = 9
PAD1 = W1 + 1                          # max |flat tap offset| on 28-wide rows
PAD2 = W2 + 1                          # max |flat tap offset| on 14-wide rows


def _tap_offsets(w):
    # flat-index offset of tap (dy, dx) for a row-major HxW map, pad=1
    return [(dy - 1) * w + (dx - 1) for dy in range(3) for dx in range(3)]


OFFS1 = _tap_offsets(W1)
OFFS2 = _tap_offsets(W2)


# ----------------------- host-side constant tables -------------------------
def _tap_masks(h, w):
    """(9, h*w) f32: 1 where tap (dy,dx) reads inside the (zero-padded) image."""
    s = jnp.arange(h * w)
    hi, wi = s // w, s % w
    rows = []
    for dy in range(3):
        for dx in range(3):
            ok = ((hi + dy - 1 >= 0) & (hi + dy - 1 < h) &
                  (wi + dx - 1 >= 0) & (wi + dx - 1 < w))
            rows.append(ok)
    return jnp.stack(rows).astype(jnp.float32)


def _pool_select(h, w):
    """(h*w, (h//2)*(w//2)) 0/1 matrix picking the top-left of each 2x2 window
    (applied after a neighbor-max to finish the 2x2/2 max-pool)."""
    ho, wo = h // 2, w // 2
    l = jnp.arange(h * w)[:, None]
    j = jnp.arange(ho * wo)[None, :]
    tgt = (j // wo) * (2 * w) + (j % wo) * 2
    return (l == tgt).astype(jnp.float32)


# ------------------------------- the kernel --------------------------------
def _cnn_fused_kernel(x_ref, w1_ref, b1_ref, w2_ref, b2_ref, gw_ref, dm_ref,
                      fold_ref, bfc_ref, m1_ref, m2_ref, sel1_ref,
                      o_ref,
                      tap1_ref, y1s_ref, p1s_ref, tap2_ref, y2s_ref):
    f32 = jnp.float32

    # ---- conv1 (1->8, 3x3, pad 1) + ReLU: tap slab + one MXU dot -----------
    # x_ref block: (1, 1, S1 + 2*PAD1); image pre-padded (flat) by the wrapper.
    for t, off in enumerate(OFFS1):
        xs = x_ref[0, :, PAD1 + off: PAD1 + off + S1]            # (1, 784)
        tap1_ref[t:t + 1, :] = xs * m1_ref[t:t + 1, :]           # edge mask
    y1 = jnp.maximum(
        jnp.dot(w1_ref[...], tap1_ref[...], preferred_element_type=f32)
        + b1_ref[...], 0.0)                                      # (8, 784)

    # ---- maxpool 2x2/2 (28x28 -> 14x14) ------------------------------------
    # neighbor-max via shifted slices of a tail-padded slab, then lane
    # compaction (stride-2 selection) as a 0/1 matmul on the MXU.
    y1s_ref[:, 0:S1] = y1
    y1s_ref[:, S1:S1 + PAD1] = jnp.zeros((C1, PAD1), f32)
    m4 = jnp.maximum(
        jnp.maximum(y1s_ref[:, 0:S1], y1s_ref[:, 1:S1 + 1]),
        jnp.maximum(y1s_ref[:, W1:S1 + W1], y1s_ref[:, W1 + 1:S1 + W1 + 1]))
    p1 = jnp.dot(m4, sel1_ref[...], preferred_element_type=f32)  # (8, 196)

    # ---- conv2 (8->16, 3x3, pad 1) + ReLU: tap slab + one MXU dot ----------
    p1s_ref[:, 0:PAD2] = jnp.zeros((C1, PAD2), f32)
    p1s_ref[:, PAD2:PAD2 + S2] = p1
    p1s_ref[:, PAD2 + S2:PAD2 + S2 + PAD2] = jnp.zeros((C1, PAD2), f32)
    for t, off in enumerate(OFFS2):
        sl = p1s_ref[:, PAD2 + off: PAD2 + off + S2]             # (8, 196)
        tap2_ref[t * C1:(t + 1) * C1, :] = sl * m2_ref[t:t + 1, :]
    y2 = jnp.maximum(
        jnp.dot(w2_ref[...], tap2_ref[...], preferred_element_type=f32)
        + b2_ref[...], 0.0)                                      # (16, 196)

    # ---- maxpool 2x2/2 (14x14 -> 7x7) fused with NCHW flatten + fc1 --------
    y2s_ref[:, 0:S2] = y2
    y2s_ref[:, S2:S2 + PAD2] = jnp.zeros((C2, PAD2), f32)
    m4b = jnp.maximum(
        jnp.maximum(y2s_ref[:, 0:S2], y2s_ref[:, 1:S2 + 1]),
        jnp.maximum(y2s_ref[:, W2:S2 + W2], y2s_ref[:, W2 + 1:S2 + W2 + 1]))
    # gw already contains pool-selection x fc weights (host precomputed):
    #   r[c, c'*10+o] = sum_l m4b[c, l] * gw[l, c'*10+o]
    r = jnp.dot(m4b, gw_ref[...], preferred_element_type=f32)    # (16, 160)
    r = r * dm_ref[...]                                          # keep c'==c
    t_row = jnp.sum(r, axis=0, keepdims=True)                    # (1, 160)
    logits = bfc_ref[...] + jnp.dot(t_row, fold_ref[...],
                                    preferred_element_type=f32)  # (1, 10)
    o_ref[0] = logits


# ------------------------------ host wrapper --------------------------------
def cnn_forward(x_nchw, kparams):
    """x_nchw: (N, 1, 28, 28) f32.  kparams: output of prepare_params()."""
    w1k, b1k, w2k, b2k, gwk, bfck = kparams
    n = x_nchw.shape[0]
    assert x_nchw.shape[1:] == (1, H1, W1)

    # flatten the single input channel and zero-pad the flat axis so every
    # tap shift is a plain static slice inside the kernel
    xf = jnp.pad(x_nchw.reshape(n, 1, S1), ((0, 0), (0, 0), (PAD1, PAD1)))

    # geometry-only constant tables (constant-folded by XLA, DMA'd once)
    m1 = _tap_masks(H1, W1)                                   # (9, 784)
    m2 = _tap_masks(H2, W2)                                   # (9, 196)
    s1 = _pool_select(H1, W1)                                 # (784, 196)
    col = jnp.arange(C2 * NCLS)
    dmask = (col[None, :] // NCLS
             == jnp.arange(C2)[:, None]).astype(jnp.float32)  # (16, 160)
    fold = (col[:, None] % NCLS
            == jnp.arange(NCLS)[None, :]).astype(jnp.float32)  # (160, 10)

    grid_spec = pltpu.PrefetchScalarGridSpec(
        num_scalar_prefetch=0,
        grid=(n,),
        in_specs=[
            pl.BlockSpec((1, 1, S1 + 2 * PAD1), lambda i: (i, 0, 0)),  # x
            pl.BlockSpec((C1, NTAP), lambda i: (0, 0)),                # w1
            pl.BlockSpec((C1, 1), lambda i: (0, 0)),                   # b1
            pl.BlockSpec((C2, NTAP * C1), lambda i: (0, 0)),           # w2
            pl.BlockSpec((C2, 1), lambda i: (0, 0)),                   # b2
            pl.BlockSpec((S2, C2 * NCLS), lambda i: (0, 0)),           # gw
            pl.BlockSpec((C2, C2 * NCLS), lambda i: (0, 0)),           # diag mask
            pl.BlockSpec((C2 * NCLS, NCLS), lambda i: (0, 0)),         # fold
            pl.BlockSpec((1, NCLS), lambda i: (0, 0)),                 # bfc
            pl.BlockSpec((NTAP, S1), lambda i: (0, 0)),                # mask1
            pl.BlockSpec((NTAP, S2), lambda i: (0, 0)),                # mask2
            pl.BlockSpec((S1, S2), lambda i: (0, 0)),                  # sel1
        ],
        out_specs=pl.BlockSpec((1, 1, NCLS), lambda i: (i, 0, 0)),
        scratch_shapes=[
            pltpu.VMEM((NTAP, S1), jnp.float32),             # conv1 tap slab
            pltpu.VMEM((C1, S1 + PAD1), jnp.float32),        # y1 shift slab
            pltpu.VMEM((C1, S2 + 2 * PAD2), jnp.float32),    # padded pool1
            pltpu.VMEM((NTAP * C1, S2), jnp.float32),        # conv2 tap slab
            pltpu.VMEM((C2, S2 + PAD2), jnp.float32),        # y2 shift slab
        ],
    )

    flops_per_img = 2 * (C1 * NTAP * S1            # conv1 dot
                         + C1 * S1 * S2            # pool1 selection dot
                         + C2 * (NTAP * C1) * S2   # conv2 dot
                         + C2 * S2 * C2 * NCLS     # pool2 + fc folded dot
                         + C2 * NCLS * NCLS)       # fold dot
    bytes_const = 4 * (NTAP * S1 + NTAP * S2 + S1 * S2 + S2 * C2 * NCLS
                       + C2 * C2 * NCLS + C2 * NCLS * NCLS
                       + C1 * NTAP + C1 + C2 * NTAP * C1 + C2 + NCLS)
    bytes_per_img = 4 * (S1 + 2 * PAD1 + NCLS)

    out = pl.pallas_call(
        _cnn_fused_kernel,
        out_shape=jax.ShapeDtypeStruct((n, 1, NCLS), jnp.float32),
        grid_spec=grid_spec,
        compiler_params=pltpu.CompilerParams(
            dimension_semantics=("parallel",),        # shard batch over TCs
            vmem_limit_bytes=32 * 1024 * 1024,
        ),
        cost_estimate=pl.CostEstimate(
            flops=int(n * flops_per_img),
            transcendentals=0,
            bytes_accessed=int(bytes_const + n * bytes_per_img),
        ),
    )(xf, w1k, b1k, w2k, b2k, gwk, dmask, fold, bfck, m1, m2, s1)
    return out.reshape(n, NCLS)


# ----------------------- parameters (PyTorch layouts) -----------------------
def init_params(key):
    """Synthetic params in native PyTorch layouts."""
    k = jax.random.split(key, 6)
    w1 = jax.random.normal(k[0], (C1, 1, 3, 3), jnp.float32) * 0.1    # (Co,Ci,kH,kW)
    b1 = jax.random.normal(k[1], (C1,), jnp.float32) * 0.1
    w2 = jax.random.normal(k[2], (C2, C1, 3, 3), jnp.float32) * 0.05
    b2 = jax.random.normal(k[3], (C2,), jnp.float32) * 0.05
    wfc = jax.random.normal(k[4], (NCLS, C2 * S3), jnp.float32) * 0.02  # (out,in)
    bfc = jax.random.normal(k[5], (NCLS,), jnp.float32) * 0.02
    return w1, b1, w2, b2, wfc, bfc


def prepare_params(torch_params):
    """One-time re-layout of PyTorch-style weights into kernel layouts."""
    w1, b1, w2, b2, wfc, bfc = torch_params
    w1k = w1.reshape(C1, NTAP)                                  # (co, tap), Ci==1
    b1k = b1.reshape(C1, 1)
    # conv2: column index = tap*8 + cin, matching the in-kernel tap slab rows
    w2k = jnp.transpose(w2, (0, 2, 3, 1)).reshape(C2, NTAP * C1)
    b2k = b2.reshape(C2, 1)
    # fold pool2 top-left selection + NCHW flatten into the fc weights:
    #   gw[l, c*10+o] = sum_s sel2[l, s] * wfc[o, c*49 + s]
    sel2 = _pool_select(H2, W2)                                 # (196, 49)
    wfc3 = wfc.reshape(NCLS, C2, S3).transpose(1, 2, 0)         # (16, 49, 10)
    gwk = jnp.einsum('ls,cso->lco', sel2, wfc3).reshape(S2, C2 * NCLS)
    bfck = bfc.reshape(1, NCLS)
    return w1k, b1k, w2k, b2k, gwk, bfck


# ------------------------- pure-JAX reference (check) -----------------------
def _reference_forward(x, torch_params):
    w1, b1, w2, b2, wfc, bfc = torch_params
    dn = ("NCHW", "OIHW", "NCHW")
    y = jax.lax.conv_general_dilated(x, w1, (1, 1), ((1, 1), (1, 1)),
                                     dimension_numbers=dn)
    y = jnp.maximum(y + b1.reshape(1, -1, 1, 1), 0.0)
    y = jax.lax.reduce_window(y, -jnp.inf, jax.lax.max,
                              (1, 1, 2, 2), (1, 1, 2, 2), "VALID")
    y = jax.lax.conv_general_dilated(y, w2, (1, 1), ((1, 1), (1, 1)),
                                     dimension_numbers=dn)
    y = jnp.maximum(y + b2.reshape(1, -1, 1, 1), 0.0)
    y = jax.lax.reduce_window(y, -jnp.inf, jax.lax.max,
                              (1, 1, 2, 2), (1, 1, 2, 2), "VALID")
    y = y.reshape(y.shape[0], -1)
    return y @ wfc.T + bfc


# ---------------------------------- main ------------------------------------
if __name__ == "__main__":
    key = jax.random.PRNGKey(0)
    kx, kp = jax.random.split(key)
    # fc1 expects 16*7*7 features => 28x28 single-channel input, batch = 2
    x = jax.random.normal(kx, (2, 1, 28, 28), jnp.float32)
    torch_params = init_params(kp)
    kparams = prepare_params(torch_params)

    out = jax.jit(cnn_forward)(x, kparams)
    out = jax.block_until_ready(out)
    assert out.shape == (2, 10) and out.dtype == jnp.float32

    ref = jax.block_until_ready(jax.jit(_reference_forward)(x, torch_params))
    if not jnp.allclose(out, ref, rtol=2e-2, atol=2e-2):
        raise AssertionError(
            f"kernel/reference mismatch, max abs err = {jnp.max(jnp.abs(out - ref))}")
    print("KERNEL_OK")
</pallas_src>

<mosaic_0001>
module attributes {stable_mosaic.version = 11 : i64} {
  func.func @_cnn_fused_kernel(%arg0: i32, %arg1: memref<1x1x842xf32, #tpu.memory_space<vmem>>, %arg2: memref<8x9xf32, #tpu.memory_space<vmem>>, %arg3: memref<8x1xf32, #tpu.memory_space<vmem>>, %arg4: memref<16x72xf32, #tpu.memory_space<vmem>>, %arg5: memref<16x1xf32, #tpu.memory_space<vmem>>, %arg6: memref<196x160xf32, #tpu.memory_space<vmem>>, %arg7: memref<16x160xf32, #tpu.memory_space<vmem>>, %arg8: memref<160x10xf32, #tpu.memory_space<vmem>>, %arg9: memref<1x10xf32, #tpu.memory_space<vmem>>, %arg10: memref<9x784xf32, #tpu.memory_space<vmem>>, %arg11: memref<9x196xf32, #tpu.memory_space<vmem>>, %arg12: memref<784x196xf32, #tpu.memory_space<vmem>>, %arg13: memref<1x1x10xf32, #tpu.memory_space<vmem>>, %arg14: memref<9x784xf32, #tpu.memory_space<vmem>>, %arg15: memref<8x813xf32, #tpu.memory_space<vmem>>, %arg16: memref<8x226xf32, #tpu.memory_space<vmem>>, %arg17: memref<72x196xf32, #tpu.memory_space<vmem>>, %arg18: memref<16x211xf32, #tpu.memory_space<vmem>>) attributes {dimension_semantics = [#tpu.dimension_semantics<parallel>], iteration_bounds = array<i64: 2>, scalar_prefetch = 0 : i64, scratch_operands = 5 : i64, tpu.core_type = #tpu.core_type<tc>, window_params = [{transform_indices = @transform_0, window_bounds = array<i64: 1, 1, 842>}, {pipeline_mode = #tpu.pipeline_mode<synchronous>, transform_indices = @transform_1, window_bounds = array<i64: 8, 9>}, {pipeline_mode = #tpu.pipeline_mode<synchronous>, transform_indices = @transform_2, window_bounds = array<i64: 8, 1>}, {pipeline_mode = #tpu.pipeline_mode<synchronous>, transform_indices = @transform_3, window_bounds = array<i64: 16, 72>}, {pipeline_mode = #tpu.pipeline_mode<synchronous>, transform_indices = @transform_4, window_bounds = array<i64: 16, 1>}, {pipeline_mode = #tpu.pipeline_mode<synchronous>, transform_indices = @transform_5, window_bounds = array<i64: 196, 160>}, {pipeline_mode = #tpu.pipeline_mode<synchronous>, transform_indices = @transform_6, window_bounds = array<i64: 16, 160>}, {pipeline_mode = #tpu.pipeline_mode<synchronous>, transform_indices = @transform_7, window_bounds = array<i64: 160, 10>}, {pipeline_mode = #tpu.pipeline_mode<synchronous>, transform_indices = @transform_8, window_bounds = array<i64: 1, 10>}, {pipeline_mode = #tpu.pipeline_mode<synchronous>, transform_indices = @transform_9, window_bounds = array<i64: 9, 784>}, {pipeline_mode = #tpu.pipeline_mode<synchronous>, transform_indices = @transform_10, window_bounds = array<i64: 9, 196>}, {pipeline_mode = #tpu.pipeline_mode<synchronous>, transform_indices = @transform_11, window_bounds = array<i64: 784, 196>}, {transform_indices = @transform_12, window_bounds = array<i64: 1, 1, 10>}]} {
    %c0 = arith.constant 0 : index
    %c0_0 = arith.constant 0 : index
    %c0_1 = arith.constant 0 : index
    %0 = vector.load %arg1[%c0, %c0_0, %c0_1] : memref<1x1x842xf32, #tpu.memory_space<vmem>>, vector<1x1x784xf32>
    %1 = vector.shape_cast %0 : vector<1x1x784xf32> to vector<1x784xf32>
    %c0_2 = arith.constant 0 : index
    %c0_3 = arith.constant 0 : index
    %2 = vector.load %arg10[%c0_2, %c0_3] : memref<9x784xf32, #tpu.memory_space<vmem>>, vector<1x784xf32>
    %3 = arith.mulf %1, %2 : vector<1x784xf32>
    %c0_4 = arith.constant 0 : index
    %c0_5 = arith.constant 0 : index
    %4 = vector.load %arg14[%c0_4, %c0_5] : memref<9x784xf32, #tpu.memory_space<vmem>>, vector<1x784xf32>
    tpu.vector_store %arg14[%c0_4, %c0_5], %3 {strides = array<i32>} : memref<9x784xf32, #tpu.memory_space<vmem>>, vector<1x784xf32>,
    %c0_6 = arith.constant 0 : index
    %c0_7 = arith.constant 0 : index
    %c1 = arith.constant 1 : index
    %5 = vector.load %arg1[%c0_6, %c0_7, %c1] : memref<1x1x842xf32, #tpu.memory_space<vmem>>, vector<1x1x784xf32>
    %6 = vector.shape_cast %5 : vector<1x1x784xf32> to vector<1x784xf32>
    %c1_8 = arith.constant 1 : index
    %c0_9 = arith.constant 0 : index
    %7 = vector.load %arg10[%c1_8, %c0_9] : memref<9x784xf32, #tpu.memory_space<vmem>>, vector<1x784xf32>
    %8 = arith.mulf %6, %7 : vector<1x784xf32>
    %c1_10 = arith.constant 1 : index
    %c0_11 = arith.constant 0 : index
    %9 = vector.load %arg14[%c1_10, %c0_11] : memref<9x784xf32, #tpu.memory_space<vmem>>, vector<1x784xf32>
    tpu.vector_store %arg14[%c1_10, %c0_11], %8 {strides = array<i32>} : memref<9x784xf32, #tpu.memory_space<vmem>>, vector<1x784xf32>,
    %c0_12 = arith.constant 0 : index
    %c0_13 = arith.constant 0 : index
    %c2 = arith.constant 2 : index
    %10 = vector.load %arg1[%c0_12, %c0_13, %c2] : memref<1x1x842xf32, #tpu.memory_space<vmem>>, vector<1x1x784xf32>
    %11 = vector.shape_cast %10 : vector<1x1x784xf32> to vector<1x784xf32>
    %c2_14 = arith.constant 2 : index
    %c0_15 = arith.constant 0 : index
    %12 = vector.load %arg10[%c2_14, %c0_15] : memref<9x784xf32, #tpu.memory_space<vmem>>, vector<1x784xf32>
    %13 = arith.mulf %11, %12 : vector<1x784xf32>
    %c2_16 = arith.constant 2 : index
    %c0_17 = arith.constant 0 : index
    %14 = vector.load %arg14[%c2_16, %c0_17] : memref<9x784xf32, #tpu.memory_space<vmem>>, vector<1x784xf32>
    tpu.vector_store %arg14[%c2_16, %c0_17], %13 {strides = array<i32>} : memref<9x784xf32, #tpu.memory_space<vmem>>, vector<1x784xf32>,
    %c0_18 = arith.constant 0 : index
    %c0_19 = arith.constant 0 : index
    %c28 = arith.constant 28 : index
    %15 = vector.load %arg1[%c0_18, %c0_19, %c28] : memref<1x1x842xf32, #tpu.memory_space<vmem>>, vector<1x1x784xf32>
    %16 = vector.shape_cast %15 : vector<1x1x784xf32> to vector<1x784xf32>
    %c3 = arith.constant 3 : index
    %c0_20 = arith.constant 0 : index
    %17 = vector.load %arg10[%c3, %c0_20] : memref<9x784xf32, #tpu.memory_space<vmem>>, vector<1x784xf32>
    %18 = arith.mulf %16, %17 : vector<1x784xf32>
    %c3_21 = arith.constant 3 : index
    %c0_22 = arith.constant 0 : index
    %19 = vector.load %arg14[%c3_21, %c0_22] : memref<9x784xf32, #tpu.memory_space<vmem>>, vector<1x784xf32>
    tpu.vector_store %arg14[%c3_21, %c0_22], %18 {strides = array<i32>} : memref<9x784xf32, #tpu.memory_space<vmem>>, vector<1x784xf32>,
    %c0_23 = arith.constant 0 : index
    %c0_24 = arith.constant 0 : index
    %c29 = arith.constant 29 : index
    %20 = vector.load %arg1[%c0_23, %c0_24, %c29] : memref<1x1x842xf32, #tpu.memory_space<vmem>>, vector<1x1x784xf32>
    %21 = vector.shape_cast %20 : vector<1x1x784xf32> to vector<1x784xf32>
    %c4 = arith.constant 4 : index
    %c0_25 = arith.constant 0 : index
    %22 = vector.load %arg10[%c4, %c0_25] : memref<9x784xf32, #tpu.memory_space<vmem>>, vector<1x784xf32>
    %23 = arith.mulf %21, %22 : vector<1x784xf32>
    %c4_26 = arith.constant 4 : index
    %c0_27 = arith.constant 0 : index
    %24 = vector.load %arg14[%c4_26, %c0_27] : memref<9x784xf32, #tpu.memory_space<vmem>>, vector<1x784xf32>
    tpu.vector_store %arg14[%c4_26, %c0_27], %23 {strides = array<i32>} : memref<9x784xf32, #tpu.memory_space<vmem>>, vector<1x784xf32>,
    %c0_28 = arith.constant 0 : index
    %c0_29 = arith.constant 0 : index
    %c30 = arith.constant 30 : index
    %25 = vector.load %arg1[%c0_28, %c0_29, %c30] : memref<1x1x842xf32, #tpu.memory_space<vmem>>, vector<1x1x784xf32>
    %26 = vector.shape_cast %25 : vector<1x1x784xf32> to vector<1x784xf32>
    %c5 = arith.constant 5 : index
    %c0_30 = arith.constant 0 : index
    %27 = vector.load %arg10[%c5, %c0_30] : memref<9x784xf32, #tpu.memory_space<vmem>>, vector<1x784xf32>
    %28 = arith.mulf %26, %27 : vector<1x784xf32>
    %c5_31 = arith.constant 5 : index
    %c0_32 = arith.constant 0 : index
    %29 = vector.load %arg14[%c5_31, %c0_32] : memref<9x784xf32, #tpu.memory_space<vmem>>, vector<1x784xf32>
    tpu.vector_store %arg14[%c5_31, %c0_32], %28 {strides = array<i32>} : memref<9x784xf32, #tpu.memory_space<vmem>>, vector<1x784xf32>,
    %c0_33 = arith.constant 0 : index
    %c0_34 = arith.constant 0 : index
    %c56 = arith.constant 56 : index
    %30 = vector.load %arg1[%c0_33, %c0_34, %c56] : memref<1x1x842xf32, #tpu.memory_space<vmem>>, vector<1x1x784xf32>
    %31 = vector.shape_cast %30 : vector<1x1x784xf32> to vector<1x784xf32>
    %c6 = arith.constant 6 : index
    %c0_35 = arith.constant 0 : index
    %32 = vector.load %arg10[%c6, %c0_35] : memref<9x784xf32, #tpu.memory_space<vmem>>, vector<1x784xf32>
    %33 = arith.mulf %31, %32 : vector<1x784xf32>
    %c6_36 = arith.constant 6 : index
    %c0_37 = arith.constant 0 : index
    %34 = vector.load %arg14[%c6_36, %c0_37] : memref<9x784xf32, #tpu.memory_space<vmem>>, vector<1x784xf32>
    tpu.vector_store %arg14[%c6_36, %c0_37], %33 {strides = array<i32>} : memref<9x784xf32, #tpu.memory_space<vmem>>, vector<1x784xf32>,
    %c0_38 = arith.constant 0 : index
    %c0_39 = arith.constant 0 : index
    %c57 = arith.constant 57 : index
    %35 = vector.load %arg1[%c0_38, %c0_39, %c57] : memref<1x1x842xf32, #tpu.memory_space<vmem>>, vector<1x1x784xf32>
    %36 = vector.shape_cast %35 : vector<1x1x784xf32> to vector<1x784xf32>
    %c7 = arith.constant 7 : index
    %c0_40 = arith.constant 0 : index
    %37 = vector.load %arg10[%c7, %c0_40] : memref<9x784xf32, #tpu.memory_space<vmem>>, vector<1x784xf32>
    %38 = arith.mulf %36, %37 : vector<1x784xf32>
    %c7_41 = arith.constant 7 : index
    %c0_42 = arith.constant 0 : index
    %39 = vector.load %arg14[%c7_41, %c0_42] : memref<9x784xf32, #tpu.memory_space<vmem>>, vector<1x784xf32>
    tpu.vector_store %arg14[%c7_41, %c0_42], %38 {strides = array<i32>} : memref<9x784xf32, #tpu.memory_space<vmem>>, vector<1x784xf32>,
    %c0_43 = arith.constant 0 : index
    %c0_44 = arith.constant 0 : index
    %c58 = arith.constant 58 : index
    %40 = vector.load %arg1[%c0_43, %c0_44, %c58] : memref<1x1x842xf32, #tpu.memory_space<vmem>>, vector<1x1x784xf32>
    %41 = vector.shape_cast %40 : vector<1x1x784xf32> to vector<1x784xf32>
    %c8 = arith.constant 8 : index
    %c0_45 = arith.constant 0 : index
    %42 = vector.load %arg10[%c8, %c0_45] : memref<9x784xf32, #tpu.memory_space<vmem>>, vector<1x784xf32>
    %43 = arith.mulf %41, %42 : vector<1x784xf32>
    %c8_46 = arith.constant 8 : index
    %c0_47 = arith.constant 0 : index
    %44 = vector.load %arg14[%c8_46, %c0_47] : memref<9x784xf32, #tpu.memory_space<vmem>>, vector<1x784xf32>
    tpu.vector_store %arg14[%c8_46, %c0_47], %43 {strides = array<i32>} : memref<9x784xf32, #tpu.memory_space<vmem>>, vector<1x784xf32>,
    %c0_48 = arith.constant 0 : index
    %c0_49 = arith.constant 0 : index
    %45 = vector.load %arg2[%c0_48, %c0_49] : memref<8x9xf32, #tpu.memory_space<vmem>>, vector<8x9xf32>
    %c0_50 = arith.constant 0 : index
    %c0_51 = arith.constant 0 : index
    %46 = vector.load %arg14[%c0_50, %c0_51] : memref<9x784xf32, #tpu.memory_space<vmem>>, vector<9x784xf32>
    %cst = arith.constant dense<0.000000e+00> : vector<8x784xf32>
    %47 = tpu.matmul %45, %46, %cst {dimension_numbers = #tpu.dot_dimension_numbers<[1], [0], [0], [1], [0, 0, 1, 1], [], []>} : vector<8x9xf32>, vector<9x784xf32>, vector<8x784xf32> -> vector<8x784xf32>
    %c0_52 = arith.constant 0 : index
    %c0_53 = arith.constant 0 : index
    %48 = vector.load %arg3[%c0_52, %c0_53] : memref<8x1xf32, #tpu.memory_space<vmem>>, vector<8x1xf32>
    %49 = vector.broadcast %48 : vector<8x1xf32> to vector<8x784xf32>
    %50 = arith.addf %47, %49 : vector<8x784xf32>
    %cst_54 = arith.constant 0.000000e+00 : f32
    %51 = vector.broadcast %cst_54 : f32 to vector<8x784xf32>
    %52 = arith.maximumf %50, %51 : vector<8x784xf32>
    %c0_55 = arith.constant 0 : index
    %c0_56 = arith.constant 0 : index
    %53 = vector.load %arg15[%c0_55, %c0_56] : memref<8x813xf32, #tpu.memory_space<vmem>>, vector<8x784xf32>
    tpu.vector_store %arg15[%c0_55, %c0_56], %52 {strides = array<i32>} : memref<8x813xf32, #tpu.memory_space<vmem>>, vector<8x784xf32>,
    %cst_57 = arith.constant 0.000000e+00 : f32
    %54 = vector.broadcast %cst_57 : f32 to vector<8x29xf32>
    %c0_58 = arith.constant 0 : index
    %c784 = arith.constant 784 : index
    %55 = vector.load %arg15[%c0_58, %c784] : memref<8x813xf32, #tpu.memory_space<vmem>>, vector<8x29xf32>
    tpu.vector_store %arg15[%c0_58, %c784], %54 {strides = array<i32>} : memref<8x813xf32, #tpu.memory_space<vmem>>, vector<8x29xf32>,
    %c0_59 = arith.constant 0 : index
    %c0_60 = arith.constant 0 : index
    %56 = vector.load %arg15[%c0_59, %c0_60] : memref<8x813xf32, #tpu.memory_space<vmem>>, vector<8x784xf32>
    %c0_61 = arith.constant 0 : index
    %c1_62 = arith.constant 1 : index
    %57 = vector.load %arg15[%c0_61, %c1_62] : memref<8x813xf32, #tpu.memory_space<vmem>>, vector<8x784xf32>
    %58 = arith.maximumf %56, %57 : vector<8x784xf32>
    %c0_63 = arith.constant 0 : index
    %c28_64 = arith.constant 28 : index
    %59 = vector.load %arg15[%c0_63, %c28_64] : memref<8x813xf32, #tpu.memory_space<vmem>>, vector<8x784xf32>
    %c0_65 = arith.constant 0 : index
    %c29_66 = arith.constant 29 : index
    %60 = vector.load %arg15[%c0_65, %c29_66] : memref<8x813xf32, #tpu.memory_space<vmem>>, vector<8x784xf32>
    %61 = arith.maximumf %59, %60 : vector<8x784xf32>
    %62 = arith.maximumf %58, %61 : vector<8x784xf32>
    %c0_67 = arith.constant 0 : index
    %c0_68 = arith.constant 0 : index
    %63 = vector.load %arg12[%c0_67, %c0_68] : memref<784x196xf32, #tpu.memory_space<vmem>>, vector<784x196xf32>
    %cst_69 = arith.constant dense<0.000000e+00> : vector<8x196xf32>
    %64 = tpu.matmul %62, %63, %cst_69 {dimension_numbers = #tpu.dot_dimension_numbers<[1], [0], [0], [1], [0, 0, 1, 1], [], []>} : vector<8x784xf32>, vector<784x196xf32>, vector<8x196xf32> -> vector<8x196xf32>
    %cst_70 = arith.constant 0.000000e+00 : f32
    %65 = vector.broadcast %cst_70 : f32 to vector<8x15xf32>
    %c0_71 = arith.constant 0 : index
    %c0_72 = arith.constant 0 : index
    %66 = vector.load %arg16[%c0_71, %c0_72] : memref<8x226xf32, #tpu.memory_space<vmem>>, vector<8x15xf32>
    tpu.vector_store %arg16[%c0_71, %c0_72], %65 {strides = array<i32>} : memref<8x226xf32, #tpu.memory_space<vmem>>, vector<8x15xf32>,
    %c0_73 = arith.constant 0 : index
    %c15 = arith.constant 15 : index
    %67 = vector.load %arg16[%c0_73, %c15] : memref<8x226xf32, #tpu.memory_space<vmem>>, vector<8x196xf32>
    tpu.vector_store %arg16[%c0_73, %c15], %64 {strides = array<i32>} : memref<8x226xf32, #tpu.memory_space<vmem>>, vector<8x196xf32>,
    %cst_74 = arith.constant 0.000000e+00 : f32
    %68 = vector.broadcast %cst_74 : f32 to vector<8x15xf32>
    %c0_75 = arith.constant 0 : index
    %c211 = arith.constant 211 : index
    %69 = vector.load %arg16[%c0_75, %c211] : memref<8x226xf32, #tpu.memory_space<vmem>>, vector<8x15xf32>
    tpu.vector_store %arg16[%c0_75, %c211], %68 {strides = array<i32>} : memref<8x226xf32, #tpu.memory_space<vmem>>, vector<8x15xf32>,
    %c0_76 = arith.constant 0 : index
    %c0_77 = arith.constant 0 : index
    %70 = vector.load %arg16[%c0_76, %c0_77] : memref<8x226xf32, #tpu.memory_space<vmem>>, vector<8x196xf32>
    %c0_78 = arith.constant 0 : index
    %c0_79 = arith.constant 0 : index
    %71 = vector.load %arg11[%c0_78, %c0_79] : memref<9x196xf32, #tpu.memory_space<vmem>>, vector<1x196xf32>
    %72 = vector.broadcast %71 : vector<1x196xf32> to vector<8x196xf32>
    %73 = arith.mulf %70, %72 : vector<8x196xf32>
    %c0_80 = arith.constant 0 : index
    %c0_81 = arith.constant 0 : index
    %74 = vector.load %arg17[%c0_80, %c0_81] : memref<72x196xf32, #tpu.memory_space<vmem>>, vector<8x196xf32>
    tpu.vector_store %arg17[%c0_80, %c0_81], %73 {strides = array<i32>} : memref<72x196xf32, #tpu.memory_space<vmem>>, vector<8x196xf32>,
    %c0_82 = arith.constant 0 : index
    %c1_83 = arith.constant 1 : index
    %75 = vector.load %arg16[%c0_82, %c1_83] : memref<8x226xf32, #tpu.memory_space<vmem>>, vector<8x196xf32>
    %c1_84 = arith.constant 1 : index
    %c0_85 = arith.constant 0 : index
    %76 = vector.load %arg11[%c1_84, %c0_85] : memref<9x196xf32, #tpu.memory_space<vmem>>, vector<1x196xf32>
    %77 = vector.broadcast %76 : vector<1x196xf32> to vector<8x196xf32>
    %78 = arith.mulf %75, %77 : vector<8x196xf32>
    %c8_86 = arith.constant 8 : index
    %c0_87 = arith.constant 0 : index
    %79 = vector.load %arg17[%c8_86, %c0_87] : memref<72x196xf32, #tpu.memory_space<vmem>>, vector<8x196xf32>
    tpu.vector_store %arg17[%c8_86, %c0_87], %78 {strides = array<i32>} : memref<72x196xf32, #tpu.memory_space<vmem>>, vector<8x196xf32>,
    %c0_88 = arith.constant 0 : index
    %c2_89 = arith.constant 2 : index
    %80 = vector.load %arg16[%c0_88, %c2_89] : memref<8x226xf32, #tpu.memory_space<vmem>>, vector<8x196xf32>
    %c2_90 = arith.constant 2 : index
    %c0_91 = arith.constant 0 : index
    %81 = vector.load %arg11[%c2_90, %c0_91] : memref<9x196xf32, #tpu.memory_space<vmem>>, vector<1x196xf32>
    %82 = vector.broadcast %81 : vector<1x196xf32> to vector<8x196xf32>
    %83 = arith.mulf %80, %82 : vector<8x196xf32>
    %c16 = arith.constant 16 : index
    %c0_92 = arith.constant 0 : index
    %84 = vector.load %arg17[%c16, %c0_92] : memref<72x196xf32, #tpu.memory_space<vmem>>, vector<8x196xf32>
    tpu.vector_store %arg17[%c16, %c0_92], %83 {strides = array<i32>} : memref<72x196xf32, #tpu.memory_space<vmem>>, vector<8x196xf32>,
    %c0_93 = arith.constant 0 : index
    %c14 = arith.constant 14 : index
    %85 = vector.load %arg16[%c0_93, %c14] : memref<8x226xf32, #tpu.memory_space<vmem>>, vector<8x196xf32>
    %c3_94 = arith.constant 3 : index
    %c0_95 = arith.constant 0 : index
    %86 = vector.load %arg11[%c3_94, %c0_95] : memref<9x196xf32, #tpu.memory_space<vmem>>, vector<1x196xf32>
    %87 = vector.broadcast %86 : vector<1x196xf32> to vector<8x196xf32>
    %88 = arith.mulf %85, %87 : vector<8x196xf32>
    %c24 = arith.constant 24 : index
    %c0_96 = arith.constant 0 : index
    %89 = vector.load %arg17[%c24, %c0_96] : memref<72x196xf32, #tpu.memory_space<vmem>>, vector<8x196xf32>
    tpu.vector_store %arg17[%c24, %c0_96], %88 {strides = array<i32>} : memref<72x196xf32, #tpu.memory_space<vmem>>, vector<8x196xf32>,
    %c0_97 = arith.constant 0 : index
    %c15_98 = arith.constant 15 : index
    %90 = vector.load %arg16[%c0_97, %c15_98] : memref<8x226xf32, #tpu.memory_space<vmem>>, vector<8x196xf32>
    %c4_99 = arith.constant 4 : index
    %c0_100 = arith.constant 0 : index
    %91 = vector.load %arg11[%c4_99, %c0_100] : memref<9x196xf32, #tpu.memory_space<vmem>>, vector<1x196xf32>
    %92 = vector.broadcast %91 : vector<1x196xf32> to vector<8x196xf32>
    %93 = arith.mulf %90, %92 : vector<8x196xf32>
    %c32 = arith.constant 32 : index
    %c0_101 = arith.constant 0 : index
    %94 = vector.load %arg17[%c32, %c0_101] : memref<72x196xf32, #tpu.memory_space<vmem>>, vector<8x196xf32>
    tpu.vector_store %arg17[%c32, %c0_101], %93 {strides = array<i32>} : memref<72x196xf32, #tpu.memory_space<vmem>>, vector<8x196xf32>,
    %c0_102 = arith.constant 0 : index
    %c16_103 = arith.constant 16 : index
    %95 = vector.load %arg16[%c0_102, %c16_103] : memref<8x226xf32, #tpu.memory_space<vmem>>, vector<8x196xf32>
    %c5_104 = arith.constant 5 : index
    %c0_105 = arith.constant 0 : index
    %96 = vector.load %arg11[%c5_104, %c0_105] : memref<9x196xf32, #tpu.memory_space<vmem>>, vector<1x196xf32>
    %97 = vector.broadcast %96 : vector<1x196xf32> to vector<8x196xf32>
    %98 = arith.mulf %95, %97 : vector<8x196xf32>
    %c40 = arith.constant 40 : index
    %c0_106 = arith.constant 0 : index
    %99 = vector.load %arg17[%c40, %c0_106] : memref<72x196xf32, #tpu.memory_space<vmem>>, vector<8x196xf32>
    tpu.vector_store %arg17[%c40, %c0_106], %98 {strides = array<i32>} : memref<72x196xf32, #tpu.memory_space<vmem>>, vector<8x196xf32>,
    %c0_107 = arith.constant 0 : index
    %c28_108 = arith.constant 28 : index
    %100 = vector.load %arg16[%c0_107, %c28_108] : memref<8x226xf32, #tpu.memory_space<vmem>>, vector<8x196xf32>
    %c6_109 = arith.constant 6 : index
    %c0_110 = arith.constant 0 : index
    %101 = vector.load %arg11[%c6_109, %c0_110] : memref<9x196xf32, #tpu.memory_space<vmem>>, vector<1x196xf32>
    %102 = vector.broadcast %101 : vector<1x196xf32> to vector<8x196xf32>
    %103 = arith.mulf %100, %102 : vector<8x196xf32>
    %c48 = arith.constant 48 : index
    %c0_111 = arith.constant 0 : index
    %104 = vector.load %arg17[%c48, %c0_111] : memref<72x196xf32, #tpu.memory_space<vmem>>, vector<8x196xf32>
    tpu.vector_store %arg17[%c48, %c0_111], %103 {strides = array<i32>} : memref<72x196xf32, #tpu.memory_space<vmem>>, vector<8x196xf32>,
    %c0_112 = arith.constant 0 : index
    %c29_113 = arith.constant 29 : index
    %105 = vector.load %arg16[%c0_112, %c29_113] : memref<8x226xf32, #tpu.memory_space<vmem>>, vector<8x196xf32>
    %c7_114 = arith.constant 7 : index
    %c0_115 = arith.constant 0 : index
    %106 = vector.load %arg11[%c7_114, %c0_115] : memref<9x196xf32, #tpu.memory_space<vmem>>, vector<1x196xf32>
    %107 = vector.broadcast %106 : vector<1x196xf32> to vector<8x196xf32>
    %108 = arith.mulf %105, %107 : vector<8x196xf32>
    %c56_116 = arith.constant 56 : index
    %c0_117 = arith.constant 0 : index
    %109 = vector.load %arg17[%c56_116, %c0_117] : memref<72x196xf32, #tpu.memory_space<vmem>>, vector<8x196xf32>
    tpu.vector_store %arg17[%c56_116, %c0_117], %108 {strides = array<i32>} : memref<72x196xf32, #tpu.memory_space<vmem>>, vector<8x196xf32>,
    %c0_118 = arith.constant 0 : index
    %c30_119 = arith.constant 30 : index
    %110 = vector.load %arg16[%c0_118, %c30_119] : memref<8x226xf32, #tpu.memory_space<vmem>>, vector<8x196xf32>
    %c8_120 = arith.constant 8 : index
    %c0_121 = arith.constant 0 : index
    %111 = vector.load %arg11[%c8_120, %c0_121] : memref<9x196xf32, #tpu.memory_space<vmem>>, vector<1x196xf32>
    %112 = vector.broadcast %111 : vector<1x196xf32> to vector<8x196xf32>
    %113 = arith.mulf %110, %112 : vector<8x196xf32>
    %c64 = arith.constant 64 : index
    %c0_122 = arith.constant 0 : index
    %114 = vector.load %arg17[%c64, %c0_122] : memref<72x196xf32, #tpu.memory_space<vmem>>, vector<8x196xf32>
    tpu.vector_store %arg17[%c64, %c0_122], %113 {strides = array<i32>} : memref<72x196xf32, #tpu.memory_space<vmem>>, vector<8x196xf32>,
    %c0_123 = arith.constant 0 : index
    %c0_124 = arith.constant 0 : index
    %115 = vector.load %arg4[%c0_123, %c0_124] : memref<16x72xf32, #tpu.memory_space<vmem>>, vector<16x72xf32>
    %c0_125 = arith.constant 0 : index
    %c0_126 = arith.constant 0 : index
    %116 = vector.load %arg17[%c0_125, %c0_126] : memref<72x196xf32, #tpu.memory_space<vmem>>, vector<72x196xf32>
    %cst_127 = arith.constant dense<0.000000e+00> : vector<16x196xf32>
    %117 = tpu.matmul %115, %116, %cst_127 {dimension_numbers = #tpu.dot_dimension_numbers<[1], [0], [0], [1], [0, 0, 1, 1], [], []>} : vector<16x72xf32>, vector<72x196xf32>, vector<16x196xf32> -> vector<16x196xf32>
    %c0_128 = arith.constant 0 : index
    %c0_129 = arith.constant 0 : index
    %118 = vector.load %arg5[%c0_128, %c0_129] : memref<16x1xf32, #tpu.memory_space<vmem>>, vector<16x1xf32>
    %119 = vector.broadcast %118 : vector<16x1xf32> to vector<16x196xf32>
    %120 = arith.addf %117, %119 : vector<16x196xf32>
    %cst_130 = arith.constant 0.000000e+00 : f32
    %121 = vector.broadcast %cst_130 : f32 to vector<16x196xf32>
    %122 = arith.maximumf %120, %121 : vector<16x196xf32>
    %c0_131 = arith.constant 0 : index
    %c0_132 = arith.constant 0 : index
    %123 = vector.load %arg18[%c0_131, %c0_132] : memref<16x211xf32, #tpu.memory_space<vmem>>, vector<16x196xf32>
    tpu.vector_store %arg18[%c0_131, %c0_132], %122 {strides = array<i32>} : memref<16x211xf32, #tpu.memory_space<vmem>>, vector<16x196xf32>,
    %cst_133 = arith.constant 0.000000e+00 : f32
    %124 = vector.broadcast %cst_133 : f32 to vector<16x15xf32>
    %c0_134 = arith.constant 0 : index
    %c196 = arith.constant 196 : index
    %125 = vector.load %arg18[%c0_134, %c196] : memref<16x211xf32, #tpu.memory_space<vmem>>, vector<16x15xf32>
    tpu.vector_store %arg18[%c0_134, %c196], %124 {strides = array<i32>} : memref<16x211xf32, #tpu.memory_space<vmem>>, vector<16x15xf32>,
    %c0_135 = arith.constant 0 : index
    %c0_136 = arith.constant 0 : index
    %126 = vector.load %arg18[%c0_135, %c0_136] : memref<16x211xf32, #tpu.memory_space<vmem>>, vector<16x196xf32>
    %c0_137 = arith.constant 0 : index
    %c1_138 = arith.constant 1 : index
    %127 = vector.load %arg18[%c0_137, %c1_138] : memref<16x211xf32, #tpu.memory_space<vmem>>, vector<16x196xf32>
    %128 = arith.maximumf %126, %127 : vector<16x196xf32>
    %c0_139 = arith.constant 0 : index
    %c14_140 = arith.constant 14 : index
    %129 = vector.load %arg18[%c0_139, %c14_140] : memref<16x211xf32, #tpu.memory_space<vmem>>, vector<16x196xf32>
    %c0_141 = arith.constant 0 : index
    %c15_142 = arith.constant 15 : index
    %130 = vector.load %arg18[%c0_141, %c15_142] : memref<16x211xf32, #tpu.memory_space<vmem>>, vector<16x196xf32>
    %131 = arith.maximumf %129, %130 : vector<16x196xf32>
    %132 = arith.maximumf %128, %131 : vector<16x196xf32>
    %c0_143 = arith.constant 0 : index
    %c0_144 = arith.constant 0 : index
    %133 = vector.load %arg6[%c0_143, %c0_144] : memref<196x160xf32, #tpu.memory_space<vmem>>, vector<196x160xf32>
    %cst_145 = arith.constant dense<0.000000e+00> : vector<16x160xf32>
    %134 = tpu.matmul %132, %133, %cst_145 {dimension_numbers = #tpu.dot_dimension_numbers<[1], [0], [0], [1], [0, 0, 1, 1], [], []>} : vector<16x196xf32>, vector<196x160xf32>, vector<16x160xf32> -> vector<16x160xf32>
    %c0_146 = arith.constant 0 : index
    %c0_147 = arith.constant 0 : index
    %135 = vector.load %arg7[%c0_146, %c0_147] : memref<16x160xf32, #tpu.memory_space<vmem>>, vector<16x160xf32>
    %136 = arith.mulf %134, %135 : vector<16x160xf32>
    %cst_148 = arith.constant dense<0.000000e+00> : vector<160xf32>
    %137 = vector.multi_reduction <add>, %136, %cst_148 [0] : vector<16x160xf32> to vector<160xf32>
    %138 = vector.shape_cast %137 : vector<160xf32> to vector<1x160xf32>
    %c0_149 = arith.constant 0 : index
    %c0_150 = arith.constant 0 : index
    %139 = vector.load %arg9[%c0_149, %c0_150] : memref<1x10xf32, #tpu.memory_space<vmem>>, vector<1x10xf32>
    %c0_151 = arith.constant 0 : index
    %c0_152 = arith.constant 0 : index
    %140 = vector.load %arg8[%c0_151, %c0_152] : memref<160x10xf32, #tpu.memory_space<vmem>>, vector<160x10xf32>
    %cst_153 = arith.constant dense<0.000000e+00> : vector<1x10xf32>
    %141 = tpu.matmul %138, %140, %cst_153 {dimension_numbers = #tpu.dot_dimension_numbers<[1], [0], [0], [1], [0, 0, 1, 1], [], []>} : vector<1x160xf32>, vector<160x10xf32>, vector<1x10xf32> -> vector<1x10xf32>
    %142 = arith.addf %139, %141 : vector<1x10xf32>
    %c0_154 = arith.constant 0 : index
    %c0_155 = arith.constant 0 : index
    %c0_156 = arith.constant 0 : index
    %143 = vector.load %arg13[%c0_154, %c0_155, %c0_156] : memref<1x1x10xf32, #tpu.memory_space<vmem>>, vector<1x1x10xf32>
    %144 = vector.shape_cast %143 : vector<1x1x10xf32> to vector<1x10xf32>
    %145 = vector.shape_cast %142 : vector<1x10xf32> to vector<1x1x10xf32>
    tpu.vector_store %arg13[%c0_154, %c0_155, %c0_156], %145 {strides = array<i32>} : memref<1x1x10xf32, #tpu.memory_space<vmem>>, vector<1x1x10xf32>,
    return
  }
  func.func @transform_0(%arg0: i32) -> (i32, i32, i32) {
    %c0_i32 = arith.constant 0 : i32
    %c0_i32_0 = arith.constant 0 : i32
    %c0_i32_1 = arith.constant 0 : i32
    return %arg0, %c0_i32, %c0_i32_0 : i32, i32, i32
  }
  func.func @transform_1(%arg0: i32) -> (i32, i32) {
    %c0_i32 = arith.constant 0 : i32
    %c0_i32_0 = arith.constant 0 : i32
    %c0_i32_1 = arith.constant 0 : i32
    return %c0_i32, %c0_i32_0 : i32, i32
  }
  func.func @transform_2(%arg0: i32) -> (i32, i32) {
    %c0_i32 = arith.constant 0 : i32
    %c0_i32_0 = arith.constant 0 : i32
    %c0_i32_1 = arith.constant 0 : i32
    return %c0_i32, %c0_i32_0 : i32, i32
  }
  func.func @transform_3(%arg0: i32) -> (i32, i32) {
    %c0_i32 = arith.constant 0 : i32
    %c0_i32_0 = arith.constant 0 : i32
    %c0_i32_1 = arith.constant 0 : i32
    return %c0_i32, %c0_i32_0 : i32, i32
  }
  func.func @transform_4(%arg0: i32) -> (i32, i32) {
    %c0_i32 = arith.constant 0 : i32
    %c0_i32_0 = arith.constant 0 : i32
    %c0_i32_1 = arith.constant 0 : i32
    return %c0_i32, %c0_i32_0 : i32, i32
  }
  func.func @transform_5(%arg0: i32) -> (i32, i32) {
    %c0_i32 = arith.constant 0 : i32
    %c0_i32_0 = arith.constant 0 : i32
    %c0_i32_1 = arith.constant 0 : i32
    return %c0_i32, %c0_i32_0 : i32, i32
  }
  func.func @transform_6(%arg0: i32) -> (i32, i32) {
    %c0_i32 = arith.constant 0 : i32
    %c0_i32_0 = arith.constant 0 : i32
    %c0_i32_1 = arith.constant 0 : i32
    return %c0_i32, %c0_i32_0 : i32, i32
  }
  func.func @transform_7(%arg0: i32) -> (i32, i32) {
    %c0_i32 = arith.constant 0 : i32
    %c0_i32_0 = arith.constant 0 : i32
    %c0_i32_1 = arith.constant 0 : i32
    return %c0_i32, %c0_i32_0 : i32, i32
  }
  func.func @transform_8(%arg0: i32) -> (i32, i32) {
    %c0_i32 = arith.constant 0 : i32
    %c0_i32_0 = arith.constant 0 : i32
    %c0_i32_1 = arith.constant 0 : i32
    return %c0_i32, %c0_i32_0 : i32, i32
  }
  func.func @transform_9(%arg0: i32) -> (i32, i32) {
    %c0_i32 = arith.constant 0 : i32
    %c0_i32_0 = arith.constant 0 : i32
    %c0_i32_1 = arith.constant 0 : i32
    return %c0_i32, %c0_i32_0 : i32, i32
  }
  func.func @transform_10(%arg0: i32) -> (i32, i32) {
    %c0_i32 = arith.constant 0 : i32
    %c0_i32_0 = arith.constant 0 : i32
    %c0_i32_1 = arith.constant 0 : i32
    return %c0_i32, %c0_i32_0 : i32, i32
  }
  func.func @transform_11(%arg0: i32) -> (i32, i32) {
    %c0_i32 = arith.constant 0 : i32
    %c0_i32_0 = arith.constant 0 : i32
    %c0_i32_1 = arith.constant 0 : i32
    return %c0_i32, %c0_i32_0 : i32, i32
  }
  func.func @transform_12(%arg0: i32) -> (i32, i32, i32) {
    %c0_i32 = arith.constant 0 : i32
    %c0_i32_0 = arith.constant 0 : i32
    %c0_i32_1 = arith.constant 0 : i32
    return %arg0, %c0_i32, %c0_i32_0 : i32, i32, i32
  }
}

</mosaic_0001>

<bundles_post_ra>
// kernel: cnn_forward.1
= control target key start
LH: loop header
LB: loop body
LE: loop exit
PB: predicated region body
PF: predicated region fallthrough
CT: control target
= control target key end

     0   :  { %s4327_s0 = inlined_call_operand.vmem [shape: f32[2,1,842], index: 0, kind: input, shape index: {}]   ;;  %s4328_s1 = inlined_call_operand.vmem [shape: f32[8,9], index: 1, kind: input, shape index: {}]   ;;  %s4329_s2 = inlined_call_operand.vmem [shape: f32[8,1], index: 2, kind: input, shape index: {}]   ;;  %s4330_s3 = inlined_call_operand.vmem [shape: f32[16,72], index: 3, kind: input, shape index: {}]   ;;  %s4331_s4 = inlined_call_operand.vmem [shape: f32[16,1], index: 4, kind: input, shape index: {}]   ;;  %s4332_s5 = inlined_call_operand.vmem [shape: f32[196,160], index: 5, kind: input, shape index: {}]   ;;  %s4333_s6 = inlined_call_operand.vmem [shape: f32[16,160], index: 6, kind: input, shape index: {}]   ;;  %s4334_s7 = inlined_call_operand.vmem [shape: f32[160,10], index: 7, kind: input, shape index: {}]   ;;  %s4335_s8 = inlined_call_operand.vmem [shape: f32[1,10], index: 8, kind: input, shape index: {}]   ;;  %s4336_s9 = inlined_call_operand.vmem [shape: f32[9,784], index: 9, kind: input, shape index: {}]   ;;  %s4337_s10 = inlined_call_operand.vmem [shape: f32[9,196], index: 10, kind: input, shape index: {}]   ;;  %s4338_s11 = inlined_call_operand.vmem [shape: f32[784,196], index: 11, kind: input, shape index: {}]   ;;  %s4339_s12 = inlined_call_operand.hbm [shape: f32[2,1,10], index: 12, kind: output, shape index: {}]  }
   0x1   :  { %4361 = sst [smem:[#allocation12_spill]] %s4327_s0 }
   0x2   :  { %17 = vsyncpa [#allocation8], 0 }
   0x3   :  { %19 = vsyncpa [#allocation8 + $0x1], 0  ;;  %s2959_s21 = smov 0   ;;  %s2961_s22 = smov 0  }
   0x4   :  { %s2963_s23 = smov 0   ;;  %s2965_s24 = smov 0  }
   0x5 LB: > { %4362 = sst [smem:[#allocation10_spill]] %s2860_s23  ;;  %s2980_s25 = sadd.s32 4294967295, %s2864_s24   ;;  %s2864_s24 = sphi %s2965_s24, %s4385_s24   ;;  %s2860_s23 = sphi %s2963_s23, %s4382_s23   ;;  %s2856_s22 = sphi %s2961_s22, %s4384_s22   ;;  %s2852_s21 = sphi %s2959_s21, %s4383_s21  }
   0x6   : > { %s2330_s26 = sadd.s32 4294967294, %s2864_s24   ;;  %s2984_s27 = sadd.s32 1, %s2864_s24  }
   0x7   : > { %s289_s28 = sadd.s32 1, %s2860_s23  ;;  %s286_s29 = ssub.s32 %s2864_s24, %s2984_s27 }
   0x8   : > { %p299_p0 = scmp.ne.s32.totalorder %s2860_s23, %s2856_s22  ;;  %p287_p1 = scmp.eq.s32.totalorder %s286_s29, 0 }
   0x9   : > { %p300_p2 = scmp.eq.s32.totalorder %s2980_s25, 1  ;;  %p305_p3 = scmp.ne.s32.totalorder %s2856_s22, %s2852_s21 }
   0xa   : > { %p306_p4 = scmp.eq.s32.totalorder %s2330_s26, 1  ;;  %p2333_p7 = scmp.ge.s32.totalorder %s2864_s24, 1 }
   0xb   : > { %s2995_s30 = scalar_select %p287_p1, %s2860_s23, %s289_s28  }
   0xc   : > { %p2997_p5 = por %p300_p2, %p299_p0  ;;  %p3001_p6 = por %p306_p4, %p305_p3 }
   0xd   : > { %4363 = sst [smem:[#allocation11_spill]] %s2995_s30  ;;  %p364_p8 = scmp.lt.s32.totalorder %s2864_s24, 3 }
   0xf   : > { %p365_p9 = pnand %p2333_p7, %p364_p8 }
  0x10   : > { %v2334_v0 = vld [vmem:[%s4336_s9 + $0x1] ss:$8 sm:$0xf] (!%p365_p9)  ;;  %v2338_v3 = vld [vmem:[%s4336_s9 + $0x3] ss:$8 sm:$0xf] (!%p365_p9)  ;;  %v413_v34 = vlaneseq (!%p365_p9) }
  0x11   : > { %368 = sbr.rel (%p365_p9) target bundleno = 2307 (0x903), region = 68  ;;  %v2335_v1 = vld [vmem:[%s4336_s9 + $0x1] ss:$8 sm:$0x70] (!%p365_p9)  ;;  %s4341_s23 = smov (!%p365_p9), 1   ;;  %vm428_vm0 = vcmask (!%p365_p9), 7168  }
  0x12   : > { %v423_v2 = vor.u32 (!%p365_p9), %v2335_v1, %v2334_v0  ;;  %v2339_v4 = vld [vmem:[%s4336_s9 + $0x3] ss:$8 sm:$0x70] (!%p365_p9)  ;;  %v2336_v5 = vld [vmem:[%s4336_s9 + $0x2] ss:$8 sm:$0xf] (!%p365_p9) }
  0x13   : > { %v469_v6 = vor.u32 (!%p365_p9), %v2339_v4, %v2338_v3  ;;  %v2337_v7 = vld [vmem:[%s4336_s9 + $0x2] ss:$8 sm:$0x70] (!%p365_p9)  ;;  %v2340_v9 = vld [vmem:[%s4336_s9 + $0x4] ss:$8 sm:$0xf] (!%p365_p9) }
  0x14   : > { %425 = vrot.lane.b32.xlu0 (!%p365_p9), %v423_v2, %s4341_s23  ;;  %v446_v8 = vor.u32 (!%p365_p9), %v2337_v7, %v2336_v5  ;;  %v2341_v10 = vld [vmem:[%s4336_s9 + $0x4] ss:$8 sm:$0x70] (!%p365_p9)  ;;  %s4343_s26 = smov (!%p365_p9), 28   ;;  %s4347_s17 = smov (!%p365_p9), 2   ;;  %vm474_vm1 = vcmask (!%p365_p9), 228352  }
  0x15   : > { %471 = vrot.lane.b32.xlu1 (!%p365_p9), %v469_v6, %s4343_s26  ;;  %v492_v11 = vor.u32 (!%p365_p9), %v2341_v10, %v2340_v9  ;;  %v2342_v12 = vld [vmem:[%s4336_s9 + $0x5] ss:$8 sm:$0xf] (!%p365_p9)  ;;  %v2344_v14 = vld [vmem:[%s4336_s9 + $0x6] ss:$8 sm:$0xf] (!%p365_p9) }
  0x16   : > { %v2343_v13 = vld [vmem:[%s4336_s9 + $0x5] ss:$8 sm:$0x70] (!%p365_p9)  ;;  %v2345_v16 = vld [vmem:[%s4336_s9 + $0x6] ss:$8 sm:$0x70] (!%p365_p9) }
  0x17   : > { %v515_v15 = vor.u32 (!%p365_p9), %v2343_v13, %v2342_v12  ;;  %v2346_v17 = vld [vmem:[%s4336_s9 + $0x7] ss:$8 sm:$0xf] (!%p365_p9)  ;;  %s4345_s29 = smov (!%p365_p9), 29   ;;  %v538_v19 = vor.u32 (!%p365_p9), %v2345_v16, %v2344_v14  ;;  %s4355_s26 = smov (!%p365_p9), 30   ;;  %vm451_vm2 = vcmask (!%p365_p9), 15360  }
  0x18   : > { %448 = vrot.lane.b32.xlu0 %v446_v8, %s4347_s17  ;;  %v2347_v18 = vld [vmem:[%s4336_s9 + $0x7] ss:$8 sm:$0x70]  ;;  %v2348_v20 = vld [vmem:[%s4336_s9 + $0x38] ss:$8 sm:$0xf] }
  0x19   : > { %494 = vrot.lane.b32.xlu1 %v492_v11, %s4345_s29  ;;  %v2349_v21 = vld [vmem:[%s4336_s9 + $0x38] ss:$8 sm:$0x70]  ;;  %v561_v22 = vor.u32 %v2347_v18, %v2346_v17  ;;  %s2871_s19 = smov 56   ;;  %s2872_s20 = smov 57   ;;  %vm497_vm3 = vcmask 236544  }
  0x1a   : > { %v584_v23 = vor.u32 %v2349_v21, %v2348_v20  ;;  %s2873_s30 = smov 58   ;;  %p404_p10 = scmp.lt.s32.totalorder %s2980_s25, 1  ;;  %v409_v30 = vld [vmem:[%s4336_s9] ss:$8 sm:$0xf]  ;;  %vm520_vm4 = vcmask 244736  }
  0x1b   : > { %s4366_s0 = sld [smem:[#allocation12_spill]]  ;;  %v410_v35 = vld [vmem:[%s4336_s9] ss:$8 sm:$0x70]  ;;  %vm3082_vm5 = vcmp.lt.s32.totalorder %v413_v34, 784  ;;  %vm543_vm6 = vcmask 457728  }
  0x1c   : > { %517 = vrot.lane.b32.xlu0 %v515_v15, %s4355_s26  ;;  %s405_s28 = scalar_select %p404_p10, %s2980_s25, 1  ;;  %v411_v40 = vor.u32 %v410_v35, %v409_v30  ;;  %vm566_vm7 = vcmask 465920   ;;  %vm589_vm8 = vcmask 474112   ;;  %v2882_v7 = vmov 0.0   ;;  %v618_v8 = vld [vmem:[%s4329_s2] sm:$0xff] }
  0x1d   : > { %540 = vrot.lane.b32.xlu1 %v538_v19, %s2871_s19  ;;  %s4351_s23 = smov 99   ;;  %s4349_s15 = smov 98   ;;  %714 = vmatprep.mubr.f32.mxu0 %v2882_v7  ;;  %v2883_v9 = vmov 0   ;;  %vm436_vm9 = vcmask 1039360   ;;  %vm459_vm10 = vcmask 1031168   ;;  %vm482_vm11 = vcmask 818176  }
  0x1e   : > { %s2708_s29 = smul.u32 7, %s405_s28  ;;  %s4357_s28 = smov 100   ;;  %785 = vmatprep.mubr.f32.mxu1 %v2882_v7  ;;  %2775 = vset.pattern.permute.xlu0 %v2883_v9  ;;  %vm505_vm12 = vcmask 809984   ;;  %vm528_vm13 = vcmask 801792   ;;  %vm551_vm14 = vcmask 588800   ;;  %vm574_vm15 = vcmask 580608  }
  0x1f   : > { %s2879_s16 = smov 72   ;;  %s2880_s18 = smov 71   ;;  %2801 = vset.pattern.permute.xlu1 %v2883_v9 }
  0x20   : > { %563 = vrot.lane.b32.xlu0 %v561_v22, %s2872_s20  ;;  %s4359_s20 = smov 127   ;;  %s4372_s26 = smov 100  }
  0x21   : > { %586 = vrot.lane.b32.xlu1 %v584_v23, %s2873_s30  ;;  %s3065_s17 = scalar_lea.vmem %s4366_s0, %s2708_s29  ;;  %s4353_s30 = smov 126  }
  0x22   : > { %v419_v25 = vld [vmem:[%s3065_s17] sm:$0x7f]  ;;  %s2881_s29 = smov 70   ;;  %s4374_s0 = smov 2  }
  0x23   : > { %v465_v32 = vld [vmem:[%s3065_s17] sm:$0x7f]  ;;  %s4375_s19 = smov 28  }
  0x24   : > { %v442_v37 = vld [vmem:[%s3065_s17] sm:$0x7f] }
  0x25   : > { %v408_v39 = vld [vmem:[%s3065_s17] sm:$0x7f] }
  0x26   : > { %v412_v44 = vmul.f32 %v411_v40, %v408_v39  ;;  %v488_v49 = vld [vmem:[%s3065_s17] sm:$0x7f] }
  0x27   : > { %v511_v51 = vld [vmem:[%s3065_s17] sm:$0x7f] }
  0x28   : > { %417 = vst.msk [vmem:[#allocation2] ss:$8 sm:$0xf] %vm3082_vm5, %v412_v44  ;;  %418 = vst.msk [vmem:[#allocation2] ss:$8 sm:$0x70] %vm3082_vm5, %v412_v44 }
  0x29   : > { %v534_v59 = vld [vmem:[%s3065_s17] sm:$0x7f] }
  0x2a   : > { %v557_v61 = vld [vmem:[%s3065_s17] sm:$0x7f] }
  0x2b   : > { %v580_v4 = vld [vmem:[%s3065_s17] sm:$0x7f]  ;;  %s2888_s17 = smov 14  }
  0x86   : > { %v426_v24 = vpop.permute.xlu0 %425 }
  0x87   : > { %v427_v26 = vrot.slane %v426_v24, 7  ;;  %v472_v27 = vpop.permute.xlu1 %471 }
  0x88   : > { %v473_v29 = vrot.slane %v472_v27, 7 }
  0x89   : > { %v429_v28 = vsel %vm428_vm0, %v427_v26, %v426_v24 }
  0x8a   : > { %v431_v31 = vmul.f32 %v429_v28, %v419_v25  ;;  %v449_v33 = vpop.permute.xlu0 %448  ;;  %v475_v36 = vsel %vm474_vm1, %v473_v29, %v472_v27 }
  0x8b   : > { %v450_v38 = vrot.slane %v449_v33, 7  ;;  %v495_v41 = vpop.permute.xlu1 %494  ;;  %v477_v45 = vmul.f32 %v475_v36, %v465_v32 }
  0x8c   : > { %433 = vrot.lane.b32.xlu0 %v431_v31, %s4359_s20  ;;  %v496_v43 = vrot.slane %v495_v41, 7 }
  0x8d   : > { %v452_v42 = vsel %vm451_vm2, %v450_v38, %v449_v33 }
  0x8e   : > { %v454_v46 = vmul.f32 %v452_v42, %v442_v37  ;;  %v518_v47 = vpop.permute.xlu0 %517  ;;  %v498_v50 = vsel %vm497_vm3, %v496_v43, %v495_v41 }
  0x8f   : > { %v519_v52 = vrot.slane %v518_v47, 7  ;;  %v541_v53 = vpop.permute.xlu1 %540  ;;  %v500_v56 = vmul.f32 %v498_v50, %v488_v49 }
  0x90   : > { %456 = vrot.lane.b32.xlu1 %v454_v46, %s4353_s30  ;;  %479 = vrot.lane.b32.xlu0 %v477_v45, %s4357_s28  ;;  %v542_v55 = vrot.slane %v541_v53, 7  ;;  %s4377_s30 = smov 30  }
  0x91   : > { %v521_v54 = vsel %vm520_vm4, %v519_v52, %v518_v47 }
  0x92   : > { %v523_v57 = vmul.f32 %v521_v54, %v511_v51  ;;  %v564_v58 = vpop.permute.xlu0 %563  ;;  %v544_v60 = vsel %vm543_vm6, %v542_v55, %v541_v53  ;;  %vm597_vm6 = vcmask 572416   ;;  %v603_v53 = vld [vmem:[%s4328_s1] sm:$0xff]  ;;  %v2885_v54 = vmov 0.0|0.0  }
  0x93   : > { %v565_v62 = vrot.slane %v564_v58, 7  ;;  %v587_v63 = vpop.permute.xlu1 %586  ;;  %v546_v2 = vmul.f32 %v544_v60, %v534_v59 }
  0x94   : > { %502 = vrot.lane.b32.xlu1 %v500_v56, %s4351_s23  ;;  %525 = vrot.lane.b32.xlu0 %v523_v57, %s4349_s15  ;;  %v588_v1 = vrot.slane %v587_v63, 7  ;;  %s4373_s15 = smov 1   ;;  %s402_s23 = sand.u32 1, %s2856_s22  }
  0x95   : > { %v567_v0 = vsel %vm566_vm7, %v565_v62, %v564_v58  ;;  %vm628_vm7 = vcmask 1040384  }
  0x96   : > { %v569_v3 = vmul.f32 %v567_v0, %v557_v61  ;;  %v590_v5 = vsel %vm589_vm8, %v588_v1, %v587_v63  ;;  %vm2884_vm8 = vmmov 1  }
  0x97   : > { %v592_v6 = vmul.f32 %v590_v5, %v580_v4 }
  0x98   : > { %548 = vrot.lane.b32.xlu1 %v546_v2, %s2879_s16  ;;  %571 = vrot.lane.b32.xlu0 %v569_v3, %s2880_s18  ;;  %s4371_s18 = smov 127   ;;  %s2889_s16 = smov 16  }
  0x9c   : > { %594 = vrot.lane.b32.xlu1 %v592_v6, %s2881_s29  ;;  %621 = vperm.xlu0 %2775, %v618_v8   ;;  %s2891_s29 = smov 113  }
  0xfe   : > { %v434_v10 = vpop.permute.xlu0 %433 }
  0xff   : > { %v435_v11 = vrot.slane %v434_v10, 1 }
 0x101   : > { %v437_v12 = vsel %vm436_vm9, %v434_v10, %v435_v11 }
 0x102   : > { %440 = vst.msk [vmem:[#allocation2 + $0x1] ss:$8 sm:$0xf] %vm3082_vm5, %v437_v12  ;;  %441 = vst.msk [vmem:[#allocation2 + $0x1] ss:$8 sm:$0x70] %vm3082_vm5, %v437_v12  ;;  %v457_v13 = vpop.permute.xlu1 %456  ;;  %v480_v14 = vpop.permute.xlu0 %479 }
 0x103   : > { %v458_v15 = vrot.slane %v457_v13, 1  ;;  %v481_v16 = vrot.slane %v480_v14, 1 }
 0x105   : > { %v460_v17 = vsel %vm459_vm10, %v457_v13, %v458_v15  ;;  %v483_v18 = vsel %vm482_vm11, %v480_v14, %v481_v16 }
 0x106   : > { %463 = vst.msk [vmem:[#allocation2 + $0x2] ss:$8 sm:$0xf] %vm3082_vm5, %v460_v17  ;;  %464 = vst.msk [vmem:[#allocation2 + $0x2] ss:$8 sm:$0x70] %vm3082_vm5, %v460_v17  ;;  %v503_v19 = vpop.permute.xlu1 %502  ;;  %v526_v20 = vpop.permute.xlu0 %525 }
 0x107   : > { %486 = vst.msk [vmem:[#allocation2 + $0x3] ss:$8 sm:$0xf] %vm3082_vm5, %v483_v18  ;;  %487 = vst.msk [vmem:[#allocation2 + $0x3] ss:$8 sm:$0x70] %vm3082_vm5, %v483_v18 }
 0x108   : > { %v504_v21 = vrot.slane %v503_v19, 1  ;;  %v527_v22 = vrot.slane %v526_v20, 1 }
 0x10a   : > { %v506_v23 = vsel %vm505_vm12, %v503_v19, %v504_v21  ;;  %v529_v24 = vsel %vm528_vm13, %v526_v20, %v527_v22  ;;  %v549_v25 = vpop.permute.xlu1 %548  ;;  %v572_v26 = vpop.permute.xlu0 %571  ;;  %v1104_v21 = vld [vmem:[%s4338_s11 + $0x208] sm:$0xff]  ;;  %v1106_v22 = vld [vmem:[%s4338_s11 + $0x218] sm:$0xff] }
 0x10b   : > { %509 = vst.msk [vmem:[#allocation2 + $0x4] ss:$8 sm:$0xf] %vm3082_vm5, %v506_v23  ;;  %510 = vst.msk [vmem:[#allocation2 + $0x4] ss:$8 sm:$0x70] %vm3082_vm5, %v506_v23 }
 0x10c   : > { %532 = vst.msk [vmem:[#allocation2 + $0x5] ss:$8 sm:$0xf] %vm3082_vm5, %v529_v24  ;;  %533 = vst.msk [vmem:[#allocation2 + $0x5] ss:$8 sm:$0x70] %vm3082_vm5, %v529_v24  ;;  %v2476_v24 = vpack.c.bf16 %v1106_v22, %v1104_v21 }
 0x10d   : > { %v550_v27 = vrot.slane %v549_v25, 1  ;;  %v573_v28 = vrot.slane %v572_v26, 1  ;;  %v1103_v23 = vld [vmem:[%s4338_s11 + $0x200] sm:$0xff] }
 0x10e   : > { %v595_v31 = vpop.permute.xlu1 %594 }
 0x10f   : > { %v552_v29 = vsel %vm551_vm14, %v549_v25, %v550_v27  ;;  %v575_v30 = vsel %vm574_vm15, %v572_v26, %v573_v28  ;;  %v596_v32 = vrot.slane %v595_v31, 1  ;;  %vm3144_vm15 = vmpackc.low %vm628_vm7, %vm2884_vm8  ;;  %vm946_vm7 = vcmask 130048   ;;  %v1105_v25 = vld [vmem:[%s4338_s11 + $0x210] sm:$0xff]  ;;  %v1108_v26 = vld [vmem:[%s4338_s11 + $0x228] sm:$0xff] }
 0x110   : > { %555 = vst.msk [vmem:[#allocation2 + $0x6] ss:$8 sm:$0xf] %vm3082_vm5, %v552_v29  ;;  %556 = vst.msk [vmem:[#allocation2 + $0x6] ss:$8 sm:$0x70] %vm3082_vm5, %v552_v29  ;;  %v2478_v28 = vpack.c.bf16 %v1105_v25, %v1103_v23 }
 0x111   : > { %578 = vst.msk [vmem:[#allocation2 + $0x7] ss:$8 sm:$0xf] %vm3082_vm5, %v575_v30  ;;  %579 = vst.msk [vmem:[#allocation2 + $0x7] ss:$8 sm:$0x70] %vm3082_vm5, %v575_v30  ;;  %v598_v33 = vsel %vm597_vm6, %v595_v31, %v596_v32 }
 0x112   : > { %601 = vst.msk [vmem:[#allocation2 + $0x38] ss:$8 sm:$0xf] %vm3082_vm5, %v598_v33  ;;  %602 = vst.msk [vmem:[#allocation2 + $0x38] ss:$8 sm:$0x70] %vm3082_vm5, %v598_v33 }
 0x113   : > { %vm624_vm5 = vcmask 72704   ;;  %vm2886_vm6 = vmmov 0   ;;  %vm948_vm8 = vcmask 367744   ;;  %v1110_v27 = vld [vmem:[%s4338_s11 + $0x238] sm:$0xff]  ;;  %v1107_v30 = vld [vmem:[%s4338_s11 + $0x220] sm:$0xff]  ;;  %v1109_v31 = vld [vmem:[%s4338_s11 + $0x230] sm:$0xff] }
 0x114   : > { %v2480_v29 = vpack.c.bf16 %v1110_v27, %v1108_v26  ;;  %v1112_v32 = vld [vmem:[%s4338_s11 + $0x248] sm:$0xff]  ;;  %v1114_v33 = vld [vmem:[%s4338_s11 + $0x258] sm:$0xff]  ;;  %v2482_v35 = vpack.c.bf16 %v1109_v31, %v1107_v30  ;;  %v1135_v23 = vld [vmem:[%s4338_s11 + $0x300] sm:$0xff] }
 0x115   : > { %v1140_v25 = vld [vmem:[%s4338_s11 + $0x328] sm:$0xff]  ;;  %v1142_v26 = vld [vmem:[%s4338_s11 + $0x338] sm:$0xff]  ;;  %v1141_v30 = vld [vmem:[%s4338_s11 + $0x330] sm:$0xff] }
 0x116   : > { %v1144_v31 = vld [vmem:[%s4338_s11 + $0x348] sm:$0xff] }
 0x118   : > { %v605_v36 = vld [vmem:[#allocation2 + $0x8] sm:$0xff]  ;;  %v607_v37 = vld [vmem:[#allocation2 + $0x18] sm:$0xff]  ;;  %v604_v38 = vld [vmem:[#allocation2] sm:$0xff] }
 0x119   : > { %v612_v39 = vld [vmem:[#allocation2 + $0x40] sm:$0x1]  ;;  %v614_v40 = vld [vmem:[#allocation2 + $0x50] sm:$0x1]  ;;  %v611_v41 = vld [vmem:[#allocation2 + $0x38] sm:$0x1] }
 0x11a   : > { %v2390_v42 = vpack.c.bf16 %v612_v39, %v605_v36  ;;  %v2396_v43 = vpack.c.bf16 %v614_v40, %v607_v37  ;;  %v2393_v44 = vpack.c.bf16 %v611_v41, %v604_v38  ;;  %v606_v45 = vld [vmem:[#allocation2 + $0x10] sm:$0xff]  ;;  %v613_v46 = vld [vmem:[#allocation2 + $0x48] sm:$0x1]  ;;  %v616_v47 = vld [vmem:[#allocation2 + $0x60] sm:$0x1]  ;;  %v2484_v36 = vpack.c.bf16 %v1114_v33, %v1112_v32 }
 0x11b   : > { %v2399_v48 = vpack.c.bf16 %v613_v46, %v606_v45  ;;  %v609_v49 = vld [vmem:[#allocation2 + $0x28] sm:$0xff]  ;;  %v615_v51 = vld [vmem:[#allocation2 + $0x58] sm:$0x1]  ;;  %v608_v55 = vld [vmem:[#allocation2 + $0x20] sm:$0xff]  ;;  %v622_v59 = vpop.permute.xlu0 %621 }
 0x11c   : > { %2392 = vmatprep.subr.msk.bf16.mxu0 %vm3144_vm15, %v2390_v42  ;;  %2398 = vmatprep.subr.msk.bf16.mxu1 %vm3144_vm15, %v2396_v43  ;;  %v2402_v50 = vpack.c.bf16 %v616_v47, %v609_v49  ;;  %v617_v52 = vld [vmem:[#allocation2 + $0x68] sm:$0x1]  ;;  %v610_v56 = vld [vmem:[#allocation2 + $0x30] sm:$0xff]  ;;  %v2405_v57 = vpack.c.bf16 %v615_v51, %v608_v55  ;;  %v1111_v37 = vld [vmem:[%s4338_s11 + $0x240] sm:$0xff] }
 0x11d   : > { %2395 = vmatpush1.bf16.msk.msra.mxu0 %vm3144_vm15, %v2393_v44  ;;  %2401 = vmatpush1.bf16.msk.msra.mxu1 %vm3144_vm15, %v2399_v48  ;;  %v2409_v58 = vpack.c.bf16 %v617_v52, %v610_v56  ;;  %v1113_v38 = vld [vmem:[%s4338_s11 + $0x250] sm:$0xff]  ;;  %v1116_v39 = vld [vmem:[%s4338_s11 + $0x268] sm:$0xff]  ;;  %v1118_v40 = vld [vmem:[%s4338_s11 + $0x278] sm:$0xff] }
 0x11e   : > { %2404 = vmatprep.subr.msk.bf16.mxu0 %vm3144_vm15, %v2402_v50  ;;  %2408 = vmatprep.subr.bf16.mxu1 %v2885_v54  ;;  %v2486_v41 = vpack.c.bf16 %v1113_v38, %v1111_v37  ;;  %v2488_v42 = vpack.c.bf16 %v1118_v40, %v1116_v39  ;;  %v1115_v43 = vld [vmem:[%s4338_s11 + $0x260] sm:$0xff]  ;;  %v1117_v44 = vld [vmem:[%s4338_s11 + $0x270] sm:$0xff]  ;;  %v1120_v45 = vld [vmem:[%s4338_s11 + $0x288] sm:$0xff] }
 0x11f   : > { %v1122_v46 = vld [vmem:[%s4338_s11 + $0x298] sm:$0xff]  ;;  %v2490_v47 = vpack.c.bf16 %v1117_v44, %v1115_v43  ;;  %v1119_v49 = vld [vmem:[%s4338_s11 + $0x280] sm:$0xff]  ;;  %v1121_v50 = vld [vmem:[%s4338_s11 + $0x290] sm:$0xff] }
 0x120   : > { %2352 = vmatmul.mubr.msk.f32.vlgmr.msra.gmra.mrb[0].mxu0 %vm624_vm5, %v603_v53  ;;  %2355 = vmatmul.mubr.msk.f32.vlgmr.msra.gmra.mrb[0].mxu1 %vm624_vm5, %v603_v53  ;;  %v2492_v48 = vpack.c.bf16 %v1122_v46, %v1120_v45  ;;  %v1124_v51 = vld [vmem:[%s4338_s11 + $0x2a8] sm:$0xff]  ;;  %v1126_v52 = vld [vmem:[%s4338_s11 + $0x2b8] sm:$0xff]  ;;  %v1123_v56 = vld [vmem:[%s4338_s11 + $0x2a0] sm:$0xff] }
 0x121   : > { %2407 = vmatpush1.bf16.msk.msra.mxu0 %vm3144_vm15, %v2405_v57  ;;  %2411 = vmatpush3.bf16.msk.msra.mxu1 %vm3144_vm15, %v2409_v58  ;;  %v2496_v55 = vpack.c.bf16 %v1126_v52, %v1124_v51  ;;  %v1125_v57 = vld [vmem:[%s4338_s11 + $0x2b0] sm:$0xff]  ;;  %v1128_v58 = vld [vmem:[%s4338_s11 + $0x2c8] sm:$0xff]  ;;  %v1146_v32 = vld [vmem:[%s4338_s11 + $0x358] sm:$0xff]  ;;  %vm1522_vm15 = vcmask 121856  }
 0x122   : > { %856 = vmatprep.mubr.f32.mxu0 %v2882_v7  ;;  %2387 = vmatprep.mubr.msk.f32.mxu1 %vm2886_vm6, %v2882_v7  ;;  %v1145_v37 = vld [vmem:[%s4338_s11 + $0x350] sm:$0xff]  ;;  %v1148_v38 = vld [vmem:[%s4338_s11 + $0x368] sm:$0xff]  ;;  %v1150_v39 = vld [vmem:[%s4338_s11 + $0x378] sm:$0xff]  ;;  %1523 = vst.msk [vmem:[#allocation4] sm:$0xff] %vm1522_vm15, %v2882_v7  ;;  %vm1535_vm6 = vcmask 678912  }
 0x123   : > { %2477 = vmatprep.subr.bf16.mxu0 %v2476_v24  ;;  %v1137_v24 = vld [vmem:[%s4338_s11 + $0x310] sm:$0xff]  ;;  %v1152_v44 = vld [vmem:[%s4338_s11 + $0x388] sm:$0xff]  ;;  %v1154_v45 = vld [vmem:[%s4338_s11 + $0x398] sm:$0xff] }
 0x124   : > { %2358 = vmatmul.mubr.msk.f32.vlgmr.msra.gmra.mrb[2].mxu0 %vm624_vm5, %v603_v53  ;;  %2388 = vmatmul.mubr.msk.f32.vlgmr.msra.gmra.mrb[2].mxu1 %vm624_vm5, %v603_v53  ;;  %v2494_v53 = vpack.c.bf16 %v1121_v50, %v1119_v49  ;;  %v2510_v27 = vpack.c.bf16 %v1137_v24, %v1135_v23  ;;  %v1149_v43 = vld [vmem:[%s4338_s11 + $0x370] sm:$0xff]  ;;  %v1156_v50 = vld [vmem:[%s4338_s11 + $0x3a8] sm:$0xff]  ;;  %v1158_v51 = vld [vmem:[%s4338_s11 + $0x3b8] sm:$0xff]  ;;  %vm1533_vm5 = vcmask 1047672  }
 0x125   : > { %2479 = vmatpush1.bf16.msra.mxu0 %v2478_v28  ;;  %v2512_v28 = vpack.c.bf16 %v1142_v26, %v1140_v25  ;;  %v1153_v49 = vld [vmem:[%s4338_s11 + $0x390] sm:$0xff] }
 0x126   : > { %2481 = vmatprep.subr.bf16.mxu0 %v2480_v29  ;;  %v1139_v29 = vld [vmem:[%s4338_s11 + $0x320] sm:$0xff] }
 0x127   : > { %v2514_v33 = vpack.c.bf16 %v1141_v30, %v1139_v29 }
 0x129   : > { %2483 = vmatpush1.bf16.msra.mxu0 %v2482_v35  ;;  %v2516_v35 = vpack.c.bf16 %v1146_v32, %v1144_v31  ;;  %v1042_v32 = vld [vmem:[%s4338_s11 + $0x18] sm:$0xff] }
 0x12a   : > { %2485 = vmatprep.subr.bf16.mxu0 %v2484_v36  ;;  %v1143_v36 = vld [vmem:[%s4338_s11 + $0x340] sm:$0xff] }
 0x12b   : > { %v2518_v40 = vpack.c.bf16 %v1145_v37, %v1143_v36 }
 0x12d   : > { %2487 = vmatpush1.bf16.msra.mxu0 %v2486_v41  ;;  %v2520_v41 = vpack.c.bf16 %v1150_v39, %v1148_v38  ;;  %v1044_v38 = vld [vmem:[%s4338_s11 + $0x28] sm:$0xff]  ;;  %v1046_v39 = vld [vmem:[%s4338_s11 + $0x38] sm:$0xff] }
 0x12e   : > { %2489 = vmatprep.subr.bf16.mxu0 %v2488_v42  ;;  %v1147_v42 = vld [vmem:[%s4338_s11 + $0x360] sm:$0xff] }
 0x12f   : > { %v2522_v46 = vpack.c.bf16 %v1149_v43, %v1147_v42  ;;  %v1045_v42 = vld [vmem:[%s4338_s11 + $0x30] sm:$0xff] }
 0x131   : > { %2491 = vmatpush1.bf16.msra.mxu0 %v2490_v47  ;;  %v2524_v47 = vpack.c.bf16 %v1154_v45, %v1152_v44  ;;  %v1048_v44 = vld [vmem:[%s4338_s11 + $0x48] sm:$0xff]  ;;  %v1050_v45 = vld [vmem:[%s4338_s11 + $0x58] sm:$0xff] }
 0x132   : > { %2493 = vmatprep.subr.bf16.mxu0 %v2492_v48  ;;  %v1151_v48 = vld [vmem:[%s4338_s11 + $0x380] sm:$0xff] }
 0x133   : > { %v2526_v52 = vpack.c.bf16 %v1153_v49, %v1151_v48  ;;  %v1049_v48 = vld [vmem:[%s4338_s11 + $0x50] sm:$0xff] }
 0x135   : > { %2495 = vmatpush1.bf16.msra.mxu0 %v2494_v53  ;;  %v2528_v53 = vpack.c.bf16 %v1158_v51, %v1156_v50  ;;  %v1052_v50 = vld [vmem:[%s4338_s11 + $0x68] sm:$0xff]  ;;  %v1054_v51 = vld [vmem:[%s4338_s11 + $0x78] sm:$0xff] }
 0x136   : > { %2497 = vmatprep.subr.bf16.mxu0 %v2496_v55  ;;  %v1155_v55 = vld [vmem:[%s4338_s11 + $0x3a0] sm:$0xff] }
 0x1f3   : > { %v716_v60 = vpop.f32.mrb[0].mxu0  ;;  %v787_v61 = vpop.f32.mrb[0].mxu1 }
 0x1f4   : > { %v3172_v62 = vadd.f32 %v716_v60, %v622_v59  ;;  %v718_v63 = vpop.f32.mrb[1].mxu0  ;;  %v3174_v0 = vadd.f32 %v787_v61, %v622_v59  ;;  %v789_v1 = vpop.f32.mrb[1].mxu1  ;;  %v2498_v60 = vpack.c.bf16 %v1125_v57, %v1123_v56  ;;  %v1157_v56 = vld [vmem:[%s4338_s11 + $0x3b0] sm:$0xff] }
 0x1f5   : > { %v3176_v2 = vadd.f32 %v718_v63, %v622_v59  ;;  %v3178_v3 = vadd.f32 %v789_v1, %v622_v59  ;;  %v1127_v63 = vld [vmem:[%s4338_s11 + $0x2c0] sm:$0xff]  ;;  %v1129_v1 = vld [vmem:[%s4338_s11 + $0x2d0] sm:$0xff]  ;;  %v2530_v57 = vpack.c.bf16 %v1157_v56, %v1155_v55 }
 0x1f6   : > { %v933_v4 = vmax.f32 %v3172_v62, 0.0  ;;  %v935_v5 = vmax.f32 %v3174_v0, 0.0  ;;  %2499 = vmatpush1.bf16.msra.mxu0 %v2498_v60  ;;  %v1159_v60 = vld [vmem:[%s4338_s11 + $0x3c0] sm:$0xff]  ;;  %v1168_v0 = vld [vmem:[%s4338_s11 + $0x408] sm:$0xff]  ;;  %v1053_v55 = vld [vmem:[%s4338_s11 + $0x70] sm:$0xff] }
 0x1f7   : > { %v934_v6 = vmax.f32 %v3176_v2, 0.0  ;;  %v936_v8 = vmax.f32 %v3178_v3, 0.0  ;;  %v858_v9 = vpop.f32.mrb[2].mxu0  ;;  %v929_v10 = vpop.f32.mrb[2].mxu1  ;;  %v1170_v3 = vld [vmem:[%s4338_s11 + $0x418] sm:$0xff] }
 0x1f8   : > { %v3184_v11 = vadd.f32 %v858_v9, %v622_v59  ;;  %v860_v12 = vpop.f32.mrb[3].mxu0  ;;  %v930_v13 = vadd.f32 %v929_v10, %v622_v59  ;;  %v2389_v14 = vpop.f32.mrb[3].mxu1  ;;  %v1132_v9 = vld [vmem:[%s4338_s11 + $0x2e8] sm:$0xff]  ;;  %v1134_v10 = vld [vmem:[%s4338_s11 + $0x2f8] sm:$0xff] }
 0x1f9   : > { %v3186_v15 = vadd.f32 %v860_v12, %v622_v59  ;;  %v1130_v59 = vld [vmem:[%s4338_s11 + $0x2d8] sm:$0xff]  ;;  %v2502_v12 = vpack.c.bf16 %v1129_v1, %v1127_v63  ;;  %v1131_v14 = vld [vmem:[%s4338_s11 + $0x2e0] sm:$0xff]  ;;  %v1161_v63 = vld [vmem:[%s4338_s11 + $0x3d0] sm:$0xff] }
 0x1fa   : > { %v937_v16 = vmax.f32 %v3184_v11, 0.0  ;;  %v939_v17 = vmax.f32 %v930_v13, 0.0  ;;  %v2500_v61 = vpack.c.bf16 %v1130_v59, %v1128_v58  ;;  %v2504_v13 = vpack.c.bf16 %v1134_v10, %v1132_v9  ;;  %v1160_v58 = vld [vmem:[%s4338_s11 + $0x3c8] sm:$0xff]  ;;  %v1162_v59 = vld [vmem:[%s4338_s11 + $0x3d8] sm:$0xff] }
 0x1fb   : > { %v938_v18 = vmax.f32 %v3186_v15, 0.0  ;;  %v2534_v1 = vpack.c.bf16 %v1161_v63, %v1159_v60  ;;  %v1164_v10 = vld [vmem:[%s4338_s11 + $0x3e8] sm:$0xff] }
 0x1fc   : > { %947 = vst.msk [vmem:[#allocation3 + $0x30] sm:$0xff] %vm946_vm7, %v939_v17  ;;  %v2776_v19 = vpack.i.bf16 %v937_v16, %v936_v8  ;;  %2501 = vmatprep.subr.bf16.mxu0 %v2500_v61  ;;  %v1133_v17 = vld [vmem:[%s4338_s11 + $0x2f0] sm:$0xff]  ;;  %v2532_v61 = vpack.c.bf16 %v1162_v59, %v1160_v58  ;;  %v1058_v58 = vld [vmem:[%s4338_s11 + $0x98] sm:$0xff]  ;;  %v1055_v59 = vld [vmem:[%s4338_s11 + $0x80] sm:$0xff] }
 0x1fd   : > { %949 = vst.msk [vmem:[#allocation3 + $0x30] sm:$0xff] %vm948_vm8, %v2882_v7  ;;  %v2781_v20 = vpack.i.bf16 %v935_v5, %v938_v18  ;;  %2503 = vmatpush1.bf16.msra.mxu0 %v2502_v12  ;;  %v2506_v21 = vpack.c.bf16 %v1133_v17, %v1131_v14  ;;  %v1166_v12 = vld [vmem:[%s4338_s11 + $0x3f8] sm:$0xff]  ;;  %vm1537_vm8 = vcmask 802456  }
 0x1fe   : > { %2777 = vrot.lane.b32.xlu1 %v2776_v19, %s4359_s20  ;;  %v1136_v19 = vld [vmem:[%s4338_s11 + $0x308] sm:$0xff]  ;;  %2505 = vmatprep.subr.bf16.mxu0 %v2504_v13  ;;  %v2536_v17 = vpack.c.bf16 %v1166_v12, %v1164_v10  ;;  %v1059_v10 = vld [vmem:[%s4338_s11 + $0xa0] sm:$0xff]  ;;  %s2887_s20 = smov 15  }
 0x201   : > { %2507 = vmatpush1.bf16.msra.mxu0 %v2506_v21 }
 0x202   : > { %2782 = vrot.lane.b32.xlu1 %v2781_v20, %s4371_s18  ;;  %v1138_v20 = vld [vmem:[%s4338_s11 + $0x318] sm:$0xff] }
 0x203   : > { %v2508_v22 = vpack.c.bf16 %v1138_v20, %v1136_v19  ;;  %v1163_v19 = vld [vmem:[%s4338_s11 + $0x3e0] sm:$0xff]  ;;  %v1165_v20 = vld [vmem:[%s4338_s11 + $0x3f0] sm:$0xff] }
 0x204   : > { %v2538_v21 = vpack.c.bf16 %v1165_v20, %v1163_v19  ;;  %v3432_v11 = vld [vmem:[#allocation3 + $0x30] sm:$0xff]  ;;  %v1066_v19 = vld [vmem:[%s4338_s11 + $0xd8] sm:$0xff] }
 0x205   : > { %2509 = vmatprep.subr.bf16.mxu0 %v2508_v22  ;;  %v1063_v20 = vld [vmem:[%s4338_s11 + $0xc0] sm:$0xff] }
 0x206   : > { %2511 = vmatpush1.bf16.msra.mxu0 %v2510_v27 }
 0x207   : > { %2513 = vmatprep.subr.bf16.mxu0 %v2512_v28 }
 0x20a   : > { %2515 = vmatpush1.bf16.msra.mxu0 %v2514_v33  ;;  %v1039_v33 = vld [vmem:[%s4338_s11] sm:$0xff] }
 0x20b   : > { %2517 = vmatprep.subr.bf16.mxu0 %v2516_v35  ;;  %v1041_v35 = vld [vmem:[%s4338_s11 + $0x10] sm:$0xff] }
 0x20c   : > { %v2414_v37 = vpack.c.bf16 %v1041_v35, %v1039_v33  ;;  %v1071_v33 = vld [vmem:[%s4338_s11 + $0x100] sm:$0xff] }
 0x20e   : > { %2519 = vmatpush1.bf16.msra.mxu0 %v2518_v40  ;;  %v2416_v40 = vpack.c.bf16 %v1046_v39, %v1044_v38  ;;  %v1076_v38 = vld [vmem:[%s4338_s11 + $0x128] sm:$0xff]  ;;  %v1078_v39 = vld [vmem:[%s4338_s11 + $0x138] sm:$0xff] }
 0x20f   : > { %2521 = vmatprep.subr.bf16.mxu0 %v2520_v41  ;;  %v1043_v41 = vld [vmem:[%s4338_s11 + $0x20] sm:$0xff] }
 0x210   : > { %v2418_v43 = vpack.c.bf16 %v1045_v42, %v1043_v41  ;;  %v2448_v41 = vpack.c.bf16 %v1078_v39, %v1076_v38  ;;  %v1077_v42 = vld [vmem:[%s4338_s11 + $0x130] sm:$0xff] }
 0x211   : > { %v1101_v38 = vld [vmem:[%s4338_s11 + $0x1f0] sm:$0xff] }
 0x212   : > { %2523 = vmatpush1.bf16.msra.mxu0 %v2522_v46  ;;  %v1047_v46 = vld [vmem:[%s4338_s11 + $0x40] sm:$0xff] }
 0x213   : > { %2525 = vmatprep.subr.bf16.mxu0 %v2524_v47  ;;  %v2420_v47 = vpack.c.bf16 %v1050_v45, %v1048_v44  ;;  %v2422_v49 = vpack.c.bf16 %v1049_v48, %v1047_v46  ;;  %v1080_v44 = vld [vmem:[%s4338_s11 + $0x148] sm:$0xff]  ;;  %v1082_v45 = vld [vmem:[%s4338_s11 + $0x158] sm:$0xff]  ;;  %v1079_v46 = vld [vmem:[%s4338_s11 + $0x140] sm:$0xff] }
 0x214   : > { %v1081_v48 = vld [vmem:[%s4338_s11 + $0x150] sm:$0xff] }
 0x216   : > { %2527 = vmatpush1.bf16.msra.mxu0 %v2526_v52  ;;  %v1051_v52 = vld [vmem:[%s4338_s11 + $0x60] sm:$0xff] }
 0x217   : > { %2529 = vmatprep.subr.bf16.mxu0 %v2528_v53  ;;  %v2424_v53 = vpack.c.bf16 %v1054_v51, %v1052_v50  ;;  %v2426_v56 = vpack.c.bf16 %v1053_v55, %v1051_v52  ;;  %v1084_v50 = vld [vmem:[%s4338_s11 + $0x168] sm:$0xff]  ;;  %v1086_v51 = vld [vmem:[%s4338_s11 + $0x178] sm:$0xff]  ;;  %v1083_v52 = vld [vmem:[%s4338_s11 + $0x160] sm:$0xff] }
 0x218   : > { %v1085_v55 = vld [vmem:[%s4338_s11 + $0x170] sm:$0xff] }
 0x21a   : > { %2531 = vmatpush1.bf16.msra.mxu0 %v2530_v57  ;;  %v1056_v57 = vld [vmem:[%s4338_s11 + $0x88] sm:$0xff] }
 0x21b   : > { %2533 = vmatprep.subr.bf16.mxu0 %v2532_v61  ;;  %v2428_v60 = vpack.c.bf16 %v1058_v58, %v1056_v57  ;;  %v1057_v61 = vld [vmem:[%s4338_s11 + $0x90] sm:$0xff]  ;;  %v1088_v57 = vld [vmem:[%s4338_s11 + $0x188] sm:$0xff]  ;;  %v1090_v58 = vld [vmem:[%s4338_s11 + $0x198] sm:$0xff] }
 0x21c   : > { %v2430_v63 = vpack.c.bf16 %v1057_v61, %v1055_v59  ;;  %v1087_v59 = vld [vmem:[%s4338_s11 + $0x180] sm:$0xff]  ;;  %v1089_v61 = vld [vmem:[%s4338_s11 + $0x190] sm:$0xff] }
 0x21e   : > { %2535 = vmatpush1.bf16.msra.mxu0 %v2534_v1  ;;  %v1060_v1 = vld [vmem:[%s4338_s11 + $0xa8] sm:$0xff] }
 0x21f   : > { %2537 = vmatprep.subr.bf16.mxu0 %v2536_v17  ;;  %v1064_v17 = vld [vmem:[%s4338_s11 + $0xc8] sm:$0xff] }
 0x222   : > { %2539 = vmatpush1.bf16.msra.mxu0 %v2538_v21  ;;  %v2436_v21 = vpack.c.bf16 %v1066_v19, %v1064_v17  ;;  %v1096_v17 = vld [vmem:[%s4338_s11 + $0x1c8] sm:$0xff]  ;;  %v1098_v19 = vld [vmem:[%s4338_s11 + $0x1d8] sm:$0xff] }
 0x270   : > { %v2778_v9 = vpop.permute.xlu1 %2777 }
 0x271   : > { %v2780_v13 = vunpack.i.h.bf16 %v2778_v9  ;;  %v2779_v14 = vunpack.i.l.bf16 %v2778_v9  ;;  %v1062_v9 = vld [vmem:[%s4338_s11 + $0xb8] sm:$0xff] }
 0x272   : > { %v2432_v12 = vpack.c.bf16 %v1062_v9, %v1060_v1  ;;  %v1092_v1 = vld [vmem:[%s4338_s11 + $0x1a8] sm:$0xff]  ;;  %v1094_v9 = vld [vmem:[%s4338_s11 + $0x1b8] sm:$0xff] }
 0x273   : > { %v981_v23 = vsel %vm436_vm9, %v2779_v14, %v2780_v13 }
 0x274   : > { %v3394_v22 = vpop.permute.xlu1 %2782  ;;  %v3411_v29 = vmax.f32 %v936_v8, %v981_v23  ;;  %v2791_v8 = vpack.i.bf16 %v933_v4, %v934_v6  ;;  %v1065_v23 = vld [vmem:[%s4338_s11 + $0xd0] sm:$0xff] }
 0x275   : > { %v2785_v24 = vunpack.i.h.bf16 %v3394_v22  ;;  %v2784_v25 = vunpack.i.l.bf16 %v3394_v22 }
 0x277   : > { %v982_v26 = vsel %vm436_vm9, %v2780_v13, %v2784_v25  ;;  %v980_v27 = vsel %vm436_vm9, %v2785_v24, %v2779_v14  ;;  %v1061_v13 = vld [vmem:[%s4338_s11 + $0xb0] sm:$0xff] }
 0x278   : > { %v3407_v28 = vmax.f32 %v935_v5, %v980_v27  ;;  %v3415_v30 = vmax.f32 %v937_v16, %v982_v26  ;;  %v2540_v5 = vpack.c.bf16 %v1170_v3, %v1168_v0  ;;  %v1040_v16 = vld [vmem:[%s4338_s11 + $0x8] sm:$0xff]  ;;  %v2434_v14 = vpack.c.bf16 %v1061_v13, %v1059_v10  ;;  %v1067_v0 = vld [vmem:[%s4338_s11 + $0xe0] sm:$0xff]  ;;  %v1093_v13 = vld [vmem:[%s4338_s11 + $0x1b0] sm:$0xff] }
 0x279   : > { %v2412_v36 = vpack.c.bf16 %v1042_v32, %v1040_v16  ;;  %v2438_v26 = vpack.c.bf16 %v1065_v23, %v1063_v20  ;;  %v1068_v27 = vld [vmem:[%s4338_s11 + $0xe8] sm:$0xff]  ;;  %v1074_v32 = vld [vmem:[%s4338_s11 + $0x118] sm:$0xff]  ;;  %v2464_v10 = vpack.c.bf16 %v1094_v9, %v1092_v1  ;;  %v1095_v20 = vld [vmem:[%s4338_s11 + $0x1c0] sm:$0xff] }
 0x27a   : > { %1009 = vrot.lane.b32.xlu1 %v3407_v28, %s4372_s26  ;;  %v2786_v31 = vpack.i.bf16 %v3415_v30, %v3411_v29  ;;  %2541 = vmatprep.subr.bf16.mxu0 %v2540_v5  ;;  %v1069_v5 = vld [vmem:[%s4338_s11 + $0xf0] sm:$0xff]  ;;  %v1072_v16 = vld [vmem:[%s4338_s11 + $0x108] sm:$0xff] }
 0x27b   : > { %2413 = vmatprep.subr.bf16.mxu1 %v2412_v36  ;;  %v2444_v35 = vpack.c.bf16 %v1074_v32, %v1072_v16  ;;  %v1073_v36 = vld [vmem:[%s4338_s11 + $0x110] sm:$0xff]  ;;  %v1102_v16 = vld [vmem:[%s4338_s11 + $0x1f8] sm:$0xff] }
 0x27c   : > { %2787 = vrot.lane.b32.xlu0 %v2786_v31, %s4372_s26  ;;  %2415 = vmatpush1.bf16.msra.mxu1 %v2414_v37  ;;  %v1070_v31 = vld [vmem:[%s4338_s11 + $0xf8] sm:$0xff]  ;;  %v2446_v37 = vpack.c.bf16 %v1073_v36, %v1071_v33  ;;  %v1097_v23 = vld [vmem:[%s4338_s11 + $0x1d0] sm:$0xff] }
 0x27d   : > { %2417 = vmatprep.subr.bf16.mxu1 %v2416_v40  ;;  %v2440_v3 = vpack.c.bf16 %v1070_v31, %v1068_v27  ;;  %v1075_v40 = vld [vmem:[%s4338_s11 + $0x120] sm:$0xff]  ;;  %v2470_v27 = vpack.c.bf16 %v1097_v23, %v1095_v20  ;;  %v1192_v23 = vld [vmem:[%s4338_s11 + $0x4c8] sm:$0xff] }
 0x27e   : > { %2792 = vrot.lane.b32.xlu1 %v2791_v8, %s4371_s18  ;;  %v2442_v8 = vpack.c.bf16 %v1069_v5, %v1067_v0  ;;  %v1167_v31 = vld [vmem:[%s4338_s11 + $0x400] sm:$0xff]  ;;  %v1169_v0 = vld [vmem:[%s4338_s11 + $0x410] sm:$0xff]  ;;  %v1172_v5 = vld [vmem:[%s4338_s11 + $0x428] sm:$0xff] }
 0x27f   : > { %v1187_v20 = vld [vmem:[%s4338_s11 + $0x4a0] sm:$0xff] }
 0x280   : > { %976 = vrot.lane.b32.xlu0 %v3432_v11, %s4371_s18  ;;  %2419 = vmatpush1.bf16.msra.mxu1 %v2418_v43  ;;  %v2450_v43 = vpack.c.bf16 %v1077_v42, %v1075_v40 }
 0x281   : > { %2421 = vmatprep.subr.bf16.mxu1 %v2420_v47  ;;  %v2452_v47 = vpack.c.bf16 %v1082_v45, %v1080_v44 }
 0x284   : > { %2423 = vmatpush1.bf16.msra.mxu1 %v2422_v49  ;;  %v2454_v49 = vpack.c.bf16 %v1081_v48, %v1079_v46  ;;  %v2542_v48 = vpack.c.bf16 %v1169_v0, %v1167_v31 }
 0x285   : > { %2425 = vmatprep.subr.bf16.mxu1 %v2424_v53  ;;  %v2456_v53 = vpack.c.bf16 %v1086_v51, %v1084_v50 }
 0x288   : > { %2427 = vmatpush1.bf16.msra.mxu1 %v2426_v56  ;;  %v2458_v56 = vpack.c.bf16 %v1085_v55, %v1083_v52 }
 0x289   : > { %2429 = vmatprep.subr.bf16.mxu1 %v2428_v60  ;;  %v2460_v60 = vpack.c.bf16 %v1090_v58, %v1088_v57 }
 0x28c   : > { %2431 = vmatpush1.bf16.msra.mxu1 %v2430_v63  ;;  %v2462_v63 = vpack.c.bf16 %v1089_v61, %v1087_v59  ;;  %v1179_v59 = vld [vmem:[%s4338_s11 + $0x460] sm:$0xff]  ;;  %v1184_v61 = vld [vmem:[%s4338_s11 + $0x488] sm:$0xff] }
 0x28d   : > { %2433 = vmatprep.subr.bf16.mxu1 %v2432_v12  ;;  %v1091_v12 = vld [vmem:[%s4338_s11 + $0x1a0] sm:$0xff] }
 0x290   : > { %2435 = vmatpush1.bf16.msra.mxu1 %v2434_v14  ;;  %v2466_v14 = vpack.c.bf16 %v1093_v13, %v1091_v12  ;;  %v1185_v12 = vld [vmem:[%s4338_s11 + $0x490] sm:$0xff]  ;;  %v1188_v13 = vld [vmem:[%s4338_s11 + $0x4a8] sm:$0xff] }
 0x291   : > { %2437 = vmatprep.subr.bf16.mxu1 %v2436_v21  ;;  %v2468_v21 = vpack.c.bf16 %v1098_v19, %v1096_v17 }
 0x294   : > { %2439 = vmatpush1.bf16.msra.mxu1 %v2438_v26 }
 0x295   : > { %2441 = vmatprep.subr.bf16.mxu1 %v2440_v3 }
 0x298   : > { %2443 = vmatpush1.bf16.msra.mxu1 %v2442_v8  ;;  %v1100_v8 = vld [vmem:[%s4338_s11 + $0x1e8] sm:$0xff] }
 0x299   : > { %2445 = vmatprep.subr.bf16.mxu1 %v2444_v35  ;;  %v1174_v35 = vld [vmem:[%s4338_s11 + $0x438] sm:$0xff]  ;;  %v2472_v36 = vpack.c.bf16 %v1102_v16, %v1100_v8  ;;  %v1193_v8 = vld [vmem:[%s4338_s11 + $0x4d0] sm:$0xff]  ;;  %v1196_v16 = vld [vmem:[%s4338_s11 + $0x4e8] sm:$0xff] }
 0x29c   : > { %2447 = vmatpush1.bf16.msra.mxu1 %v2446_v37  ;;  %v1099_v37 = vld [vmem:[%s4338_s11 + $0x1e0] sm:$0xff] }
 0x29d   : > { %2449 = vmatprep.subr.bf16.mxu1 %v2448_v41  ;;  %v2474_v40 = vpack.c.bf16 %v1101_v38, %v1099_v37  ;;  %v1195_v37 = vld [vmem:[%s4338_s11 + $0x4e0] sm:$0xff]  ;;  %v1197_v38 = vld [vmem:[%s4338_s11 + $0x4f0] sm:$0xff] }
 0x2a0   : > { %2451 = vmatpush1.bf16.msra.mxu1 %v2450_v43 }
 0x2a1   : > { %2453 = vmatprep.subr.bf16.mxu1 %v2452_v47 }
 0x2a4   : > { %2455 = vmatpush1.bf16.msra.mxu1 %v2454_v49  ;;  %v2544_v49 = vpack.c.bf16 %v1174_v35, %v1172_v5  ;;  %v1191_v5 = vld [vmem:[%s4338_s11 + $0x4c0] sm:$0xff] }
 0x2a5   : > { %2457 = vmatprep.subr.bf16.mxu1 %v2456_v53  ;;  %v2566_v35 = vpack.c.bf16 %v1193_v8, %v1191_v5  ;;  %v1227_v8 = vld [vmem:[%s4338_s11 + $0x5e0] sm:$0xff] }
 0x2a8   : > { %2459 = vmatpush1.bf16.msra.mxu1 %v2458_v56  ;;  %v1182_v56 = vld [vmem:[%s4338_s11 + $0x478] sm:$0xff] }
 0x2a9   : > { %2461 = vmatprep.subr.bf16.mxu1 %v2460_v60  ;;  %v1181_v60 = vld [vmem:[%s4338_s11 + $0x470] sm:$0xff] }
 0x2aa   : > { %v2554_v1 = vpack.c.bf16 %v1181_v60, %v1179_v59  ;;  %v1215_v60 = vld [vmem:[%s4338_s11 + $0x580] sm:$0xff] }
 0x2ac   : > { %2463 = vmatpush1.bf16.msra.mxu1 %v2462_v63  ;;  %v1186_v63 = vld [vmem:[%s4338_s11 + $0x498] sm:$0xff] }
 0x2ad   : > { %2465 = vmatprep.subr.bf16.mxu1 %v2464_v10  ;;  %v2556_v9 = vpack.c.bf16 %v1186_v63, %v1184_v61  ;;  %v1183_v10 = vld [vmem:[%s4338_s11 + $0x480] sm:$0xff]  ;;  %v1217_v61 = vld [vmem:[%s4338_s11 + $0x590] sm:$0xff]  ;;  %v1220_v63 = vld [vmem:[%s4338_s11 + $0x5a8] sm:$0xff] }
 0x2ae   : > { %v2558_v17 = vpack.c.bf16 %v1185_v12, %v1183_v10  ;;  %v1219_v12 = vld [vmem:[%s4338_s11 + $0x5a0] sm:$0xff] }
 0x2b0   : > { %2467 = vmatpush1.bf16.msra.mxu1 %v2466_v14  ;;  %v1190_v14 = vld [vmem:[%s4338_s11 + $0x4b8] sm:$0xff] }
 0x2b1   : > { %2469 = vmatprep.subr.bf16.mxu1 %v2468_v21  ;;  %v2560_v19 = vpack.c.bf16 %v1190_v14, %v1188_v13  ;;  %v1189_v21 = vld [vmem:[%s4338_s11 + $0x4b0] sm:$0xff]  ;;  %v1224_v14 = vld [vmem:[%s4338_s11 + $0x5c8] sm:$0xff] }
 0x2b2   : > { %v2562_v31 = vpack.c.bf16 %v1189_v21, %v1187_v20  ;;  %v1221_v13 = vld [vmem:[%s4338_s11 + $0x5b0] sm:$0xff]  ;;  %v1223_v21 = vld [vmem:[%s4338_s11 + $0x5c0] sm:$0xff] }
 0x2b4   : > { %2471 = vmatpush1.bf16.msra.mxu1 %v2470_v27  ;;  %v1194_v27 = vld [vmem:[%s4338_s11 + $0x4d8] sm:$0xff] }
 0x2b5   : > { %2473 = vmatprep.subr.bf16.mxu1 %v2472_v36  ;;  %v2564_v0 = vpack.c.bf16 %v1194_v27, %v1192_v23  ;;  %v1225_v23 = vld [vmem:[%s4338_s11 + $0x5d0] sm:$0xff]  ;;  %v1228_v27 = vld [vmem:[%s4338_s11 + $0x5e8] sm:$0xff] }
 0x2b8   : > { %2475 = vmatpush1.bf16.msra.mxu1 %v2474_v40  ;;  %v1202_v40 = vld [vmem:[%s4338_s11 + $0x518] sm:$0xff] }
 0x2ec   : > { %v3617_v26 = vpop.permute.xlu1 %1009 }
 0x2ee   : > { %v3625_v3 = vpop.permute.xlu0 %2787 }
 0x2ef   : > { %v2790_v32 = vunpack.i.h.bf16 %v3625_v3  ;;  %v2789_v33 = vunpack.i.l.bf16 %v3625_v3 }
 0x2f0   : > { %v2793_v39 = vpop.permute.xlu1 %2792 }
 0x2f1   : > { %v1021_v41 = vsel %vm482_vm11, %v3617_v26, %v2789_v33  ;;  %v2795_v42 = vunpack.i.h.bf16 %v2793_v39  ;;  %v2794_v43 = vunpack.i.l.bf16 %v2793_v39  ;;  %v1022_v44 = vsel %vm482_vm11, %v2789_v33, %v2790_v32  ;;  %v1198_v33 = vld [vmem:[%s4338_s11 + $0x4f8] sm:$0xff]  ;;  %v1200_v39 = vld [vmem:[%s4338_s11 + $0x508] sm:$0xff] }
 0x2f2   : > { %v1034_v45 = vmax.f32 %v3407_v28, %v1021_v41  ;;  %v977_v46 = vpop.permute.xlu0 %976  ;;  %v1035_v47 = vmax.f32 %v3411_v29, %v1022_v44  ;;  %v1171_v28 = vld [vmem:[%s4338_s11 + $0x420] sm:$0xff]  ;;  %v1173_v29 = vld [vmem:[%s4338_s11 + $0x430] sm:$0xff]  ;;  %v2568_v36 = vpack.c.bf16 %v1198_v33, %v1196_v16  ;;  %v2570_v41 = vpack.c.bf16 %v1197_v38, %v1195_v37  ;;  %v1232_v33 = vld [vmem:[%s4338_s11 + $0x608] sm:$0xff] }
 0x2f3   : > { %v978_v50 = vsel %vm436_vm9, %v2795_v42, %v2794_v43  ;;  %v979_v51 = vsel %vm436_vm9, %v2794_v43, %v2785_v24  ;;  %v983_v52 = vsel %vm436_vm9, %v2784_v25, %v977_v46  ;;  %v3662_v53 = vmax.f32 %v3432_v11, %v977_v46  ;;  %v1176_v25 = vld [vmem:[%s4338_s11 + $0x448] sm:$0xff]  ;;  %v1178_v11 = vld [vmem:[%s4338_s11 + $0x458] sm:$0xff]  ;;  %v1199_v43 = vld [vmem:[%s4338_s11 + $0x500] sm:$0xff] }
 0x2f4   : > { %v3672_v55 = vmax.f32 %v938_v18, %v983_v52  ;;  %1373 = vmatprep.mubr.f32.mxu0 %v1035_v47  ;;  %v3676_v22 = vmax.f32 %v933_v4, %v978_v50  ;;  %v3680_v24 = vmax.f32 %v934_v6, %v979_v51  ;;  %v2546_v62 = vpack.c.bf16 %v1173_v29, %v1171_v28  ;;  %v1175_v4 = vld [vmem:[%s4338_s11 + $0x440] sm:$0xff]  ;;  %v1177_v6 = vld [vmem:[%s4338_s11 + $0x450] sm:$0xff]  ;;  %v1180_v18 = vld [vmem:[%s4338_s11 + $0x468] sm:$0xff] }
 0x2f5   : > { %1374 = vmatmul.mubr.f32.vlgmr.msra.gmra.mrb[4].mxu0 %v1034_v45  ;;  %1017 = vrot.lane.b32.xlu1 %v3662_v53, %s4372_s26  ;;  %v2548_v2 = vpack.c.bf16 %v1178_v11, %v1176_v25  ;;  %v2550_v57 = vpack.c.bf16 %v1177_v6, %v1175_v4  ;;  %v2552_v58 = vpack.c.bf16 %v1182_v56, %v1180_v18  ;;  %v1201_v44 = vld [vmem:[%s4338_s11 + $0x510] sm:$0xff]  ;;  %v1204_v45 = vld [vmem:[%s4338_s11 + $0x528] sm:$0xff]  ;;  %v1206_v46 = vld [vmem:[%s4338_s11 + $0x538] sm:$0xff] }
 0x2f6   : > { %1015 = vrot.lane.b32.xlu0 %v3672_v55, %s4372_s26  ;;  %2543 = vmatpush1.bf16.msra.mxu0 %v2542_v48  ;;  %v2796_v15 = vpack.i.bf16 %v3676_v22, %v3680_v24  ;;  %v2572_v42 = vpack.c.bf16 %v1202_v40, %v1200_v39  ;;  %v2574_v47 = vpack.c.bf16 %v1201_v44, %v1199_v43  ;;  %v1205_v50 = vld [vmem:[%s4338_s11 + $0x530] sm:$0xff]  ;;  %v1208_v51 = vld [vmem:[%s4338_s11 + $0x548] sm:$0xff]  ;;  %v1210_v52 = vld [vmem:[%s4338_s11 + $0x558] sm:$0xff] }
 0x2f7   : > { %2545 = vmatprep.subr.bf16.mxu0 %v2544_v49  ;;  %v2576_v48 = vpack.c.bf16 %v1206_v46, %v1204_v45  ;;  %v1203_v49 = vld [vmem:[%s4338_s11 + $0x520] sm:$0xff]  ;;  %v2580_v29 = vpack.c.bf16 %v1210_v52, %v1208_v51  ;;  %v1209_v11 = vld [vmem:[%s4338_s11 + $0x550] sm:$0xff]  ;;  %v1216_v56 = vld [vmem:[%s4338_s11 + $0x588] sm:$0xff]  ;;  %v1544_v51 = vshrl.u32 %v413_v34, 7 }
 0x2f8   : > { %v2578_v28 = vpack.c.bf16 %v1205_v50, %v1203_v49  ;;  %v1207_v25 = vld [vmem:[%s4338_s11 + $0x540] sm:$0xff]  ;;  %v1213_v18 = vld [vmem:[%s4338_s11 + $0x570] sm:$0xff] }
 0x2f9   : > { %v2582_v4 = vpack.c.bf16 %v1209_v11, %v1207_v25  ;;  %v1229_v16 = vld [vmem:[%s4338_s11 + $0x5f0] sm:$0xff]  ;;  %v1231_v39 = vld [vmem:[%s4338_s11 + $0x600] sm:$0xff]  ;;  %v3885_v52 = vsub.s32 0, %v1544_v51 }
 0x2fa   : > { %2797 = vrot.lane.b32.xlu0 %v2796_v15, %s4372_s26  ;;  %2547 = vmatpush1.bf16.msra.mxu0 %v2546_v62  ;;  %v1212_v62 = vld [vmem:[%s4338_s11 + $0x568] sm:$0xff]  ;;  %v1211_v15 = vld [vmem:[%s4338_s11 + $0x560] sm:$0xff]  ;;  %v1233_v40 = vld [vmem:[%s4338_s11 + $0x610] sm:$0xff] }
 0x2fb   : > { %2549 = vmatprep.subr.bf16.mxu0 %v2548_v2  ;;  %v1214_v2 = vld [vmem:[%s4338_s11 + $0x578] sm:$0xff]  ;;  %v2606_v46 = vpack.c.bf16 %v1233_v40, %v1231_v39  ;;  %v2363_v25 = vld [vmem:[%s4337_s10 + $0x2] ss:$8 sm:$0x3] }
 0x2fc   : > { %v2584_v6 = vpack.c.bf16 %v1214_v2, %v1212_v62 }
 0x2fe   : > { %2551 = vmatpush1.bf16.msra.mxu0 %v2550_v57  ;;  %v1218_v57 = vld [vmem:[%s4338_s11 + $0x598] sm:$0xff] }
 0x2ff   : > { %2553 = vmatprep.subr.bf16.mxu0 %v2552_v58  ;;  %v2586_v58 = vpack.c.bf16 %v1213_v18, %v1211_v15  ;;  %v2588_v59 = vpack.c.bf16 %v1218_v57, %v1216_v56  ;;  %v2365_v56 = vld [vmem:[%s4337_s10 + $0x4] ss:$8 sm:$0x3] }
 0x302   : > { %2555 = vmatpush1.bf16.msra.mxu0 %v2554_v1  ;;  %v1222_v1 = vld [vmem:[%s4338_s11 + $0x5b8] sm:$0xff] }
 0x303   : > { %2557 = vmatprep.subr.bf16.mxu0 %v2556_v9  ;;  %v2590_v9 = vpack.c.bf16 %v1217_v61, %v1215_v60  ;;  %v2592_v10 = vpack.c.bf16 %v1222_v1, %v1220_v63  ;;  %v2367_v63 = vld [vmem:[%s4337_s10 + $0x6] ss:$8 sm:$0x3] }
 0x306   : > { %2559 = vmatpush1.bf16.msra.mxu0 %v2558_v17  ;;  %v1226_v17 = vld [vmem:[%s4338_s11 + $0x5d8] sm:$0xff] }
 0x307   : > { %2561 = vmatprep.subr.bf16.mxu0 %v2560_v19  ;;  %v2594_v19 = vpack.c.bf16 %v1221_v13, %v1219_v12  ;;  %v2596_v20 = vpack.c.bf16 %v1226_v17, %v1224_v14  ;;  %v2369_v14 = vld [vmem:[%s4337_s10 + $0x10] ss:$8 sm:$0x3] }
 0x30a   : > { %2563 = vmatpush1.bf16.msra.mxu0 %v2562_v31  ;;  %v1230_v31 = vld [vmem:[%s4338_s11 + $0x5f8] sm:$0xff] }
 0x30b   : > { %2565 = vmatprep.subr.bf16.mxu0 %v2564_v0  ;;  %v2598_v0 = vpack.c.bf16 %v1225_v23, %v1223_v21  ;;  %v2600_v5 = vpack.c.bf16 %v1230_v31, %v1228_v27 }
 0x30e   : > { %2567 = vmatpush1.bf16.msra.mxu0 %v2566_v35  ;;  %v1234_v35 = vld [vmem:[%s4338_s11 + $0x618] sm:$0xff] }
 0x30f   : > { %2569 = vmatprep.subr.bf16.mxu0 %v2568_v36  ;;  %v2602_v36 = vpack.c.bf16 %v1229_v16, %v1227_v8  ;;  %v2604_v37 = vpack.c.bf16 %v1234_v35, %v1232_v33 }
 0x312   : > { %2571 = vmatpush1.bf16.msra.mxu0 %v2570_v41 }
 0x313   : > { %2573 = vmatprep.subr.bf16.mxu0 %v2572_v42 }
 0x316   : > { %2575 = vmatpush1.bf16.msra.mxu0 %v2574_v47 }
 0x317   : > { %2577 = vmatprep.subr.bf16.mxu0 %v2576_v48 }
 0x31a   : > { %2579 = vmatpush1.bf16.msra.mxu0 %v2578_v28  ;;  %v3890_v28 = vsub.s32 1, %v1544_v51 }
 0x31b   : > { %2581 = vmatprep.subr.bf16.mxu0 %v2580_v29 }
 0x31c   : > { %v1603_v15 = vrot.slane %v2363_v25, %v3890_v28  ;;  %v1671_v60 = vrot.slane %v2365_v56, %v3890_v28  ;;  %v1739_v12 = vrot.slane %v2367_v63, %v3890_v28 }
 0x31e   : > { %2583 = vmatpush1.bf16.msra.mxu0 %v2582_v4  ;;  %v1599_v4 = vrot.slane %v2363_v25, %v3885_v52 }
 0x31f   : > { %2585 = vmatprep.subr.bf16.mxu0 %v2584_v6  ;;  %v2364_v6 = vld [vmem:[%s4337_s10 + $0x3] ss:$8 sm:$0x3] }
 0x320   : > { %v1632_v18 = vrot.slane %v2364_v6, %v3885_v52  ;;  %v1636_v57 = vrot.slane %v2364_v6, %v3890_v28 }
 0x322   : > { %2587 = vmatpush1.bf16.msra.mxu0 %v2586_v58  ;;  %v1667_v58 = vrot.slane %v2365_v56, %v3885_v52 }
 0x323   : > { %2589 = vmatprep.subr.bf16.mxu0 %v2588_v59  ;;  %v2366_v59 = vld [vmem:[%s4337_s10 + $0x5] ss:$8 sm:$0x3] }
 0x324   : > { %v1701_v61 = vrot.slane %v2366_v59, %v3885_v52  ;;  %v1705_v1 = vrot.slane %v2366_v59, %v3890_v28 }
 0x326   : > { %2591 = vmatpush1.bf16.msra.mxu0 %v2590_v9  ;;  %v1735_v9 = vrot.slane %v2367_v63, %v3885_v52 }
 0x327   : > { %2593 = vmatprep.subr.bf16.mxu0 %v2592_v10  ;;  %v2368_v10 = vld [vmem:[%s4337_s10 + $0x7] ss:$8 sm:$0x3] }
 0x328   : > { %v1768_v13 = vrot.slane %v2368_v10, %v3885_v52  ;;  %v1772_v17 = vrot.slane %v2368_v10, %v3890_v28 }
 0x32a   : > { %2595 = vmatpush1.bf16.msra.mxu0 %v2594_v19  ;;  %v1801_v19 = vrot.slane %v2369_v14, %v3885_v52 }
 0x32b   : > { %2597 = vmatprep.subr.bf16.mxu0 %v2596_v20  ;;  %v1805_v20 = vrot.slane %v2369_v14, %v3890_v28 }
 0x32e   : > { %2599 = vmatpush1.bf16.msra.mxu0 %v2598_v0  ;;  %v1541_v0 = vld [vmem:[%s4337_s10] ss:$8 sm:$0x3] }
 0x32f   : > { %2601 = vmatprep.subr.bf16.mxu0 %v2600_v5  ;;  %v1546_v16 = vrot.slane %v1541_v0, %v3885_v52  ;;  %v1550_v35 = vrot.slane %v1541_v0, %v3890_v28 }
 0x332   : > { %2603 = vmatpush1.bf16.msra.mxu0 %v2602_v36 }
 0x333   : > { %2605 = vmatprep.subr.bf16.mxu0 %v2604_v37 }
 0x367   : > { %v1018_v38 = vpop.permute.xlu1 %1017 }
 0x368   : > { %v1016_v41 = vpop.permute.xlu0 %1015 }
 0x369   : > { %v1023_v42 = vsel %vm482_vm11, %v2790_v32, %v1016_v41  ;;  %v1024_v43 = vsel %vm482_vm11, %v1016_v41, %v1018_v38 }
 0x36a   : > { %v1036_v44 = vmax.f32 %v3415_v30, %v1023_v42  ;;  %v1037_v45 = vmax.f32 %v3672_v55, %v1024_v43  ;;  %v1038_v55 = vmax.f32 %v3662_v53, %v1018_v38 }
 0x36c   : > { %1444 = vmatprep.mubr.f32.mxu0 %v1037_v45  ;;  %v2798_v47 = vpop.permute.xlu0 %2797 }
 0x36d   : > { %v2800_v48 = vunpack.i.h.bf16 %v2798_v47  ;;  %v2799_v49 = vunpack.i.l.bf16 %v2798_v47  ;;  %1445 = vmatmul.mubr.f32.vlgmr.msra.gmra.mrb[4].mxu0 %v1036_v44 }
 0x36e   : > { %2607 = vmatpush1.bf16.msra.mxu0 %v2606_v46  ;;  %1515 = vmatprep.mubr.f32.mxu0 %v2882_v7 }
 0x36f   : > { %v1019_v50 = vsel %vm482_vm11, %v2800_v48, %v2799_v49  ;;  %v1020_v3 = vsel %vm482_vm11, %v2799_v49, %v3617_v26  ;;  %v2362_v26 = vld [vmem:[%s4337_s10 + $0x1] ss:$8 sm:$0x3] }
 0x370   : > { %v1032_v32 = vmax.f32 %v3676_v22, %v1019_v50  ;;  %v1033_v30 = vmax.f32 %v3680_v24, %v1020_v3  ;;  %v1566_v22 = vrot.slane %v2362_v26, %v3885_v52  ;;  %v1570_v24 = vrot.slane %v2362_v26, %v3890_v28 }
 0x372   : > { %1302 = vmatprep.mubr.f32.mxu1 %v1033_v30  ;;  %1571 = vrot.lane.b32.xlu1 %v1566_v22, %s4373_s15 }
 0x373   : > { %1303 = vmatmul.mubr.f32.vlgmr.msra.gmra.mrb[4].mxu1 %v1032_v32  ;;  %1573 = vrot.lane.b32.xlu0 %v1570_v24, %s4373_s15  ;;  %s4380_s15 = smov 98  }
 0x375   : > { %2361 = vmatmul.mubr.msk.f32.vlgmr.msra.gmra.mrb[4].mxu0 %vm946_vm7, %v1038_v55 }
 0x376   : > { %1928 = vmatprep.mubr.f32.mxu0 %v2882_v7 }
 0x3e4   : > { %v1572_v21 = vpop.permute.xlu1 %1571 }
 0x3e5   : > { %v1574_v23 = vpop.permute.xlu0 %1573 }
 0x3e6   : > { %v1575_v41 = vsel %vm428_vm0, %v1572_v21, %v1574_v23  ;;  %vm1653_vm0 = vcmask 932864  }
 0x446   : > { %v1304_v34 = vpop.f32.mrb[4].mxu1 }
 0x447   : > { %v1306_v53 = vpop.f32.mrb[5].mxu1 }
 0x448   : > { %v1517_v29 = vpop.f32.mrb[4].mxu0 }
 0x449   : > { %v2702_v11 = vadd.f32 %v1517_v29, %v1304_v34  ;;  %v1519_v62 = vpop.f32.mrb[5].mxu0 }
 0x44a   : > { %v2703_v2 = vadd.f32 %v1519_v62, %v1306_v53 }
 0x44b   : > { %1526 = vrot.lane.b32.xlu1 %v2702_v11, %s2887_s20 }
 0x44c   : > { %1528 = vrot.lane.b32.xlu0 %v2703_v2, %s2887_s20 }
 0x44f   : > { %1604 = vrot.lane.b32.xlu1 %v1599_v4, %s4374_s0 }
 0x450   : > { %1606 = vrot.lane.b32.xlu0 %v1603_v15, %s4374_s0  ;;  %s2890_s0 = smov 114  }
 0x453   : > { %1637 = vrot.lane.b32.xlu1 %v1632_v18, %s2888_s17 }
 0x454   : > { %1639 = vrot.lane.b32.xlu0 %v1636_v57, %s2888_s17  ;;  %s4379_s17 = smov 99  }
 0x457   : > { %1672 = vrot.lane.b32.xlu1 %v1667_v58, %s2887_s20 }
 0x458   : > { %1674 = vrot.lane.b32.xlu0 %v1671_v60, %s2887_s20  ;;  %s4376_s20 = smov 29   ;;  %v1847_v60 = vld [vmem:[%s4331_s4 + $0x8] sm:$0xff] }
 0x45b   : > { %1706 = vrot.lane.b32.xlu1 %v1701_v61, %s2889_s16  ;;  %v1846_v61 = vld [vmem:[%s4331_s4] sm:$0xff] }
 0x45c   : > { %1708 = vrot.lane.b32.xlu0 %v1705_v1, %s2889_s16  ;;  %s4378_s16 = smov 126  }
 0x45f   : > { %1740 = vrot.lane.b32.xlu1 %v1735_v9, %s4375_s19 }
 0x460   : > { %1742 = vrot.lane.b32.xlu0 %v1739_v12, %s4375_s19  ;;  %s2892_s19 = smov 112  }
 0x463   : > { %1773 = vrot.lane.b32.xlu1 %v1768_v13, %s4376_s20 }
 0x464   : > { %1775 = vrot.lane.b32.xlu0 %v1772_v17, %s4376_s20 }
 0x467   : > { %1806 = vrot.lane.b32.xlu1 %v1801_v19, %s4377_s30 }
 0x468   : > { %1808 = vrot.lane.b32.xlu0 %v1805_v20, %s4377_s30 }
 0x4bd   : > { %v1527_v27 = vpop.permute.xlu1 %1526 }
 0x4be   : > { %1534 = vst.msk [vmem:[#allocation4] sm:$0xff] %vm1533_vm5, %v1527_v27  ;;  %v1529_v31 = vpop.permute.xlu0 %1528  ;;  %vm1556_vm5 = vcmask 556032  }
 0x4bf   : > { %v1530_v5 = vsel %vm1522_vm15, %v1527_v27, %v1529_v31 }
 0x4c0   : > { %1536 = vst.msk [vmem:[#allocation4 + $0x8] sm:$0xff] %vm1535_vm6, %v1530_v5  ;;  %vm1641_vm6 = vcmask 113664  }
 0x4c1   : > { %1538 = vst.msk [vmem:[#allocation4 + $0x8] sm:$0xff] %vm1537_vm8, %v2882_v7  ;;  %v1605_v8 = vpop.permute.xlu1 %1604 }
 0x4c2   : > { %v1607_v33 = vpop.permute.xlu0 %1606 }
 0x4c3   : > { %v1608_v43 = vsel %vm451_vm2, %v1605_v8, %v1607_v33  ;;  %vm1721_vm2 = vcmask 916480  }
 0x4c5   : > { %v1539_v36 = vld [vmem:[#allocation4] sm:$0xff]  ;;  %v1638_v37 = vpop.permute.xlu1 %1637 }
 0x4c6   : > { %v3948_v38 = vmul.f32 %v1546_v16, %v1539_v36  ;;  %v1578_v39 = vmul.f32 %v1572_v21, %v1539_v36  ;;  %v1640_v40 = vpop.permute.xlu0 %1639  ;;  %v1611_v47 = vmul.f32 %v1605_v8, %v1539_v36  ;;  %v1645_v32 = vmul.f32 %v1638_v37, %v1539_v36 }
 0x4c7   : > { %v1642_v50 = vsel %vm1641_vm6, %v1638_v37, %v1640_v40 }
 0x4c8   : > { %v1540_v42 = vld [vmem:[#allocation4 + $0x8] sm:$0xff]  ;;  %1582 = vrot.lane.b32.xlu1 %v1578_v39, %s4371_s18 }
 0x4c9   : > { %v1554_v44 = vmul.f32 %v1550_v35, %v1540_v42  ;;  %v1673_v45 = vpop.permute.xlu1 %1672  ;;  %v1579_v46 = vmul.f32 %v1575_v41, %v1540_v42  ;;  %v1612_v49 = vmul.f32 %v1608_v43, %v1540_v42  ;;  %v1646_v55 = vmul.f32 %v1642_v50, %v1540_v42 }
 0x4ca   : > { %v1675_v48 = vpop.permute.xlu0 %1674  ;;  %v1679_v52 = vmul.f32 %v1673_v45, %v1539_v36 }
 0x4cb   : > { %1584 = vrot.lane.b32.xlu0 %v1579_v46, %s4371_s18  ;;  %1557 = vst.msk [vmem:[#allocation5 + $0x8] sm:$0xff] %vm1556_vm5, %v1554_v44  ;;  %v1676_v51 = vsel %vm1522_vm15, %v1673_v45, %v1675_v48 }
 0x4cc   : > { %1615 = vrot.lane.b32.xlu1 %v1611_v47, %s4378_s16  ;;  %v1680_v22 = vmul.f32 %v1676_v51, %v1540_v42 }
 0x4cd   : > { %v1707_v3 = vpop.permute.xlu1 %1706 }
 0x4ce   : > { %v1709_v30 = vpop.permute.xlu0 %1708  ;;  %v1713_v34 = vmul.f32 %v1707_v3, %v1539_v36 }
 0x4cf   : > { %1617 = vrot.lane.b32.xlu0 %v1612_v49, %s4378_s16  ;;  %v1710_v24 = vsel %vm946_vm7, %v1707_v3, %v1709_v30  ;;  %s2377_s16 = sshll.u32 %s2980_s25, 4  ;;  %s2893_s25 = smov [#allocation7]  }
 0x4d0   : > { %1649 = vrot.lane.b32.xlu1 %v1645_v32, %s2890_s0  ;;  %v1714_v53 = vmul.f32 %v1710_v24, %v1540_v42  ;;  %s2806_s30 = sshll.u32 %s2893_s25, 4  ;;  %s2807_s30 = int_to_ptr.vmem [resolvable:$false] %s2806_s30 }
 0x4d1   : > { %v1741_v28 = vpop.permute.xlu1 %1740  ;;  %s2808_s28 = scalar_lea.vmem %s2807_s30, 32 }
 0x4d2   : > { %v1743_v26 = vpop.permute.xlu0 %1742  ;;  %v1747_v62 = vmul.f32 %v1741_v28, %v1539_v36  ;;  %v1829_v17 = vld [vmem:[#allocation5 + $0x8] sm:$0xff] }
 0x4d3   : > { %1651 = vrot.lane.b32.xlu0 %v1646_v55, %s2890_s0  ;;  %v1744_v25 = vsel %vm474_vm1, %v1741_v28, %v1743_v26  ;;  %vm1687_vm1 = vcmask 924672   ;;  %v1826_v26 = vld [vmem:[%s4330_s3] sm:$0xff]  ;;  %v1827_v28 = vld [vmem:[%s4330_s3 + $0x8] sm:$0xff] }
 0x4d4   : > { %1683 = vrot.lane.b32.xlu1 %v1679_v52, %s2891_s29  ;;  %v1748_v2 = vmul.f32 %v1744_v25, %v1540_v42 }
 0x4d5   : > { %v1774_v11 = vpop.permute.xlu1 %1773 }
 0x4d6   : > { %v1776_v29 = vpop.permute.xlu0 %1775  ;;  %v1780_v15 = vmul.f32 %v1774_v11, %v1539_v36 }
 0x4d7   : > { %1685 = vrot.lane.b32.xlu0 %v1680_v22, %s2891_s29  ;;  %v1777_v4 = vsel %vm497_vm3, %v1774_v11, %v1776_v29  ;;  %vm1949_vm3 = vcmask 679456   ;;  %s403_s29 = scalar_lea.vmem [#allocation7], %s402_s23 }
 0x4d8   : > { %1717 = vrot.lane.b32.xlu1 %v1713_v34, %s2892_s19  ;;  %v1781_v56 = vmul.f32 %v1777_v4, %v1540_v42 }
 0x4d9   : > { %v1807_v18 = vpop.permute.xlu1 %1806 }
 0x4da   : > { %v1809_v6 = vpop.permute.xlu0 %1808  ;;  %v1813_v58 = vmul.f32 %v1807_v18, %v1539_v36 }
 0x4db   : > { %1719 = vrot.lane.b32.xlu0 %v1714_v53, %s2892_s19  ;;  %v1810_v57 = vsel %vm520_vm4, %v1807_v18, %v1809_v6  ;;  %vm2056_vm4 = vcmask 1043456   ;;  %s2275_s19 = sshll.u32 %s403_s29, 4  ;;  %s4287_s19 = int_to_ptr.vmem [resolvable:$true] %s2275_s19 }
 0x4dc   : > { %1751 = vrot.lane.b32.xlu1 %v1747_v62, %s4372_s26  ;;  %v1814_v59 = vmul.f32 %v1810_v57, %v1540_v42  ;;  %v2001_v57 = vld [vmem:[%s4332_s5 + $0x8] sm:$0xff]  ;;  %s2802_s20 = scalar_lea.vmem %s4287_s19, 16  ;;  %p2809_p0 = scmp.lt.s32.totalorder %s4287_s19, %s2807_s30 }
 0x4dd   : > { %p2803_p11 = scmp.ne.s32.totalorder %s4287_s19, %s2802_s20  ;;  %p2810_p1 = scmp.lt.s32.totalorder %s2808_s28, %s2802_s20 }
 0x4df   : > { %1753 = vrot.lane.b32.xlu0 %v1748_v2, %s4372_s26  ;;  %p2804_p12 = pnand %p2803_p11, %p2997_p5  ;;  %p2811_p2 = por %p2810_p1, %p2809_p0 }
 0x4e0   : > { %1784 = vrot.lane.b32.xlu1 %v1780_v15, %s4379_s17 }
 0x4e1   : > { %p2805_p13 = pneg %p2804_p12 }
 0x4e3   : > { %1786 = vrot.lane.b32.xlu0 %v1781_v56, %s4379_s17  ;;  %s4285_s17 = scalar_lea.hbm %s4339_s12, %s2377_s16  ;;  %p2812_p3 = pnand %p2811_p2, %p2805_p13 }
 0x4e4   : > { %1817 = vrot.lane.b32.xlu1 %v1813_v58, %s4380_s15  ;;  %v2003_v58 = vld [vmem:[%s4332_s5 + $0x18] sm:$0xff] }
 0x4e7   : > { %1819 = vrot.lane.b32.xlu0 %v1814_v59, %s4380_s15  ;;  %v2000_v59 = vld [vmem:[%s4332_s5] sm:$0xff]  ;;  %s2263_s15 = scalar_lea.sflag [#allocation8], %s402_s23 }
 0x4e8   : > { %1850 = vperm.xlu1 %2801, %v1846_v61   ;;  %v2002_v61 = vld [vmem:[%s4332_s5 + $0x10] sm:$0xff] }
 0x4eb   : > { %1855 = vperm.xlu0 %2775, %v1847_v60   ;;  %v2624_v60 = vpack.c.bf16 %v2003_v58, %v2001_v57  ;;  %v2036_v57 = vld [vmem:[%s4332_s5 + $0x120] sm:$0xff]  ;;  %v2038_v58 = vld [vmem:[%s4332_s5 + $0x130] sm:$0xff] }
 0x4ed   : > { %2625 = vmatprep.subr.bf16.mxu1 %v2624_v60  ;;  %v2043_v60 = vld [vmem:[%s4332_s5 + $0x158] sm:$0xff] }
 0x53a   : > { %v1583_v63 = vpop.permute.xlu1 %1582 }
 0x53d   : > { %v1585_v1 = vpop.permute.xlu0 %1584 }
 0x53e   : > { %v1586_v9 = vsel %vm436_vm9, %v1583_v63, %v1585_v1  ;;  %1590 = vst.msk [vmem:[#allocation5 + $0x18] sm:$0xff] %vm1556_vm5, %v1585_v1  ;;  %v1616_v10 = vpop.permute.xlu1 %1615  ;;  %v2005_v63 = vld [vmem:[%s4332_s5 + $0x28] sm:$0xff]  ;;  %v2007_v1 = vld [vmem:[%s4332_s5 + $0x38] sm:$0xff] }
 0x53f   : > { %v2610_v31 = vpack.c.bf16 %v1586_v9, %v3948_v38  ;;  %v2626_v9 = vpack.c.bf16 %v2002_v61, %v2000_v59  ;;  %v2041_v59 = vld [vmem:[%s4332_s5 + $0x148] sm:$0xff]  ;;  %v2662_v61 = vpack.c.bf16 %v2038_v58, %v2036_v57  ;;  %v2184_v58 = vld [vmem:[%s4334_s7 + $0x90] sm:$0xff] }
 0x541   : > { %v1618_v12 = vpop.permute.xlu0 %1617  ;;  %2627 = vmatpush1.bf16.msra.mxu1 %v2626_v9  ;;  %v2042_v9 = vld [vmem:[%s4332_s5 + $0x150] sm:$0xff] }
 0x542   : > { %v1619_v13 = vsel %vm459_vm10, %v1616_v10, %v1618_v12  ;;  %1623 = vst.msk [vmem:[#allocation5 + $0x28] sm:$0xff] %vm1556_vm5, %v1618_v12  ;;  %v1650_v14 = vpop.permute.xlu1 %1649  ;;  %v2628_v10 = vpack.c.bf16 %v2007_v1, %v2005_v63  ;;  %v2004_v12 = vld [vmem:[%s4332_s5 + $0x20] sm:$0xff]  ;;  %v2664_v63 = vpack.c.bf16 %v2043_v60, %v2041_v59  ;;  %v2185_v59 = vld [vmem:[%s4334_s7 + $0x98] sm:$0xff]  ;;  %vm2260_vm10 = vcmask 73728  }
 0x543   : > { %v2040_v1 = vld [vmem:[%s4332_s5 + $0x140] sm:$0xff]  ;;  %v2700_v60 = vpack.c.bf16 %v2185_v59, %v2184_v58 }
 0x544   : > { %2629 = vmatprep.subr.bf16.mxu1 %v2628_v10  ;;  %v2045_v10 = vld [vmem:[%s4332_s5 + $0x168] sm:$0xff] }
 0x545   : > { %v1652_v19 = vpop.permute.xlu0 %1651  ;;  %v1831_v20 = vld [vmem:[#allocation5 + $0x18] sm:$0xff] }
 0x546   : > { %v1654_v21 = vsel %vm1653_vm0, %v1650_v14, %v1652_v19  ;;  %1658 = vst.msk [vmem:[#allocation5 + $0x38] sm:$0xff] %vm1556_vm5, %v1652_v19  ;;  %v1684_v23 = vpop.permute.xlu1 %1683  ;;  %v2608_v27 = vpack.c.bf16 %v1831_v20, %v1829_v17  ;;  %v2009_v14 = vld [vmem:[%s4332_s5 + $0x48] sm:$0xff]  ;;  %v2011_v17 = vld [vmem:[%s4332_s5 + $0x58] sm:$0xff] }
 0x547   : > { %v2614_v40 = vpack.c.bf16 %v1654_v21, %v1619_v13  ;;  %v2006_v13 = vld [vmem:[%s4332_s5 + $0x30] sm:$0xff]  ;;  %v2632_v20 = vpack.c.bf16 %v2011_v17, %v2009_v14  ;;  %v2008_v21 = vld [vmem:[%s4332_s5 + $0x40] sm:$0xff] }
 0x548   : > { %2609 = vmatprep.subr.bf16.mxu0 %v2608_v27  ;;  %v2013_v27 = vld [vmem:[%s4332_s5 + $0x68] sm:$0xff]  ;;  %v2044_v17 = vld [vmem:[%s4332_s5 + $0x160] sm:$0xff] }
 0x549   : > { %2611 = vmatpush1.bf16.msra.mxu0 %v2610_v31  ;;  %v1686_v0 = vpop.permute.xlu0 %1685  ;;  %v1833_v33 = vld [vmem:[#allocation5 + $0x28] sm:$0xff]  ;;  %v2015_v31 = vld [vmem:[%s4332_s5 + $0x78] sm:$0xff] }
 0x54a   : > { %v1688_v5 = vsel %vm1687_vm1, %v1684_v23, %v1686_v0  ;;  %1692 = vst.msk [vmem:[#allocation5 + $0x48] sm:$0xff] %vm1556_vm5, %v1686_v0  ;;  %v1718_v8 = vpop.permute.xlu1 %1717  ;;  %v2010_v23 = vld [vmem:[%s4332_s5 + $0x50] sm:$0xff] }
 0x54b   : > { %v2634_v0 = vpack.c.bf16 %v2010_v23, %v2008_v21  ;;  %v2049_v21 = vld [vmem:[%s4332_s5 + $0x188] sm:$0xf]  ;;  %v2048_v23 = vld [vmem:[%s4332_s5 + $0x180] sm:$0xf] }
 0x54d   : > { %v1720_v16 = vpop.permute.xlu0 %1719  ;;  %v1835_v35 = vld [vmem:[#allocation5 + $0x38] sm:$0xff] }
 0x54e   : > { %v1722_v36 = vsel %vm1721_vm2, %v1718_v8, %v1720_v16  ;;  %1726 = vst.msk [vmem:[#allocation5 + $0x58] sm:$0xff] %vm1556_vm5, %v1720_v16  ;;  %v1752_v37 = vpop.permute.xlu1 %1751  ;;  %v2612_v39 = vpack.c.bf16 %v1835_v35, %v1833_v33  ;;  %v2636_v8 = vpack.c.bf16 %v2015_v31, %v2013_v27  ;;  %v2012_v16 = vld [vmem:[%s4332_s5 + $0x60] sm:$0xff]  ;;  %v2014_v33 = vld [vmem:[%s4332_s5 + $0x70] sm:$0xff]  ;;  %v2017_v35 = vld [vmem:[%s4332_s5 + $0x88] sm:$0xff] }
 0x54f   : > { %v2618_v48 = vpack.c.bf16 %v1722_v36, %v1688_v5  ;;  %v2019_v36 = vld [vmem:[%s4332_s5 + $0x98] sm:$0xff] }
 0x550   : > { %2613 = vmatprep.subr.bf16.mxu0 %v2612_v39  ;;  %v2640_v39 = vpack.c.bf16 %v2019_v36, %v2017_v35 }
 0x551   : > { %2615 = vmatpush1.bf16.msra.mxu0 %v2614_v40  ;;  %v1754_v38 = vpop.permute.xlu0 %1753  ;;  %v1837_v44 = vld [vmem:[#allocation5 + $0x48] sm:$0xff] }
 0x552   : > { %v1755_v41 = vsel %vm482_vm11, %v1752_v37, %v1754_v38  ;;  %1759 = vst.msk [vmem:[#allocation5 + $0x68] sm:$0xff] %vm1556_vm5, %v1754_v38  ;;  %v1785_v42 = vpop.permute.xlu1 %1784  ;;  %v2638_v37 = vpack.c.bf16 %v2014_v33, %v2012_v16  ;;  %v2016_v40 = vld [vmem:[%s4332_s5 + $0x80] sm:$0xff]  ;;  %v2018_v38 = vld [vmem:[%s4332_s5 + $0x90] sm:$0xff] }
 0x555   : > { %v1787_v43 = vpop.permute.xlu0 %1786  ;;  %v1839_v45 = vld [vmem:[#allocation5 + $0x58] sm:$0xff] }
 0x556   : > { %v1788_v46 = vsel %vm505_vm12, %v1785_v42, %v1787_v43  ;;  %1792 = vst.msk [vmem:[#allocation5 + $0x78] sm:$0xff] %vm1556_vm5, %v1787_v43  ;;  %v2616_v47 = vpack.c.bf16 %v1839_v45, %v1837_v44  ;;  %v1818_v49 = vpop.permute.xlu1 %1817  ;;  %v2023_v42 = vld [vmem:[%s4332_s5 + $0xb8] sm:$0xff]  ;;  %v2642_v43 = vpack.c.bf16 %v2018_v38, %v2016_v40  ;;  %v2020_v45 = vld [vmem:[%s4332_s5 + $0xa0] sm:$0xff] }
 0x557   : > { %v2622_v51 = vpack.c.bf16 %v1788_v46, %v1755_v41  ;;  %v2021_v41 = vld [vmem:[%s4332_s5 + $0xa8] sm:$0xff]  ;;  %v2022_v46 = vld [vmem:[%s4332_s5 + $0xb0] sm:$0xff] }
 0x558   : > { %2617 = vmatprep.subr.bf16.mxu0 %v2616_v47  ;;  %v2644_v44 = vpack.c.bf16 %v2023_v42, %v2021_v41  ;;  %v2025_v47 = vld [vmem:[%s4332_s5 + $0xc8] sm:$0xff]  ;;  %v2169_v42 = vld [vmem:[%s4334_s7 + $0x18] sm:$0xff] }
 0x559   : > { %2619 = vmatpush1.bf16.msra.mxu0 %v2618_v48  ;;  %v1820_v50 = vpop.permute.xlu0 %1819  ;;  %v1841_v32 = vld [vmem:[#allocation5 + $0x68] sm:$0xff]  ;;  %v2027_v48 = vld [vmem:[%s4332_s5 + $0xd8] sm:$0xff] }
 0x55a   : > { %v1821_v3 = vsel %vm528_vm13, %v1818_v49, %v1820_v50  ;;  %1825 = vst.msk [vmem:[#allocation5 + $0x88] sm:$0xff] %vm1556_vm5, %v1820_v50  ;;  %v2646_v49 = vpack.c.bf16 %v2022_v46, %v2020_v45  ;;  %v2648_v50 = vpack.c.bf16 %v2027_v48, %v2025_v47 }
 0x55d   : > { %v1843_v30 = vld [vmem:[#allocation5 + $0x78] sm:$0xff] }
 0x55e   : > { %v2620_v55 = vpack.c.bf16 %v1843_v30, %v1841_v32  ;;  %v2026_v32 = vld [vmem:[%s4332_s5 + $0xd0] sm:$0xff]  ;;  %v2029_v30 = vld [vmem:[%s4332_s5 + $0xe8] sm:$0xff] }
 0x560   : > { %2621 = vmatprep.subr.bf16.mxu0 %v2620_v55  ;;  %v2031_v55 = vld [vmem:[%s4332_s5 + $0xf8] sm:$0xff] }
 0x561   : > { %2623 = vmatpush1.bf16.msra.mxu0 %v2622_v51  ;;  %v1845_v52 = vld [vmem:[#allocation5 + $0x88] sm:$0xff] }
 0x562   : > { %1880 = vmatprep.subr.mxu0 %v1845_v52  ;;  %v2652_v52 = vpack.c.bf16 %v2031_v55, %v2029_v30  ;;  %v2173_v30 = vld [vmem:[%s4334_s7 + $0x38] sm:$0xff] }
 0x565   : > { %1881 = vmatpush1.msra.mxu0 %v1821_v3  ;;  %v2024_v3 = vld [vmem:[%s4332_s5 + $0xc0] sm:$0xff] }
 0x566   : > { %2370 = vmatmul.mubr.msk.f32.vlgmr.msra.gmra.mrb[6].mxu0 %vm551_vm14, %v1826_v26  ;;  %v2650_v51 = vpack.c.bf16 %v2026_v32, %v2024_v3  ;;  %v2028_v26 = vld [vmem:[%s4332_s5 + $0xe0] sm:$0xff]  ;;  %v2172_v32 = vld [vmem:[%s4334_s7 + $0x30] sm:$0xff] }
 0x567   : > { %1934 = vmatprep.mubr.f32.mxu0 %v2882_v7  ;;  %v1851_v22 = vpop.permute.xlu1 %1850  ;;  %v2682_v55 = vpack.c.bf16 %v2173_v30, %v2172_v32 }
 0x56a   : > { %2371 = vmatmul.mubr.msk.f32.gmra.mrb[8].mxu0 %vm551_vm14, %v1827_v28  ;;  %v1856_v11 = vpop.permute.xlu0 %1855  ;;  %v2030_v28 = vld [vmem:[%s4332_s5 + $0xf0] sm:$0xff] }
 0x639   : > { %v1930_v24 = vpop.f32.mrb[6].mxu0 }
 0x63a   : > { %v4000_v34 = vadd.f32 %v1930_v24, %v1851_v22  ;;  %v1932_v53 = vpop.f32.mrb[7].mxu0  ;;  %v2035_v24 = vld [vmem:[%s4332_s5 + $0x118] sm:$0xff] }
 0x63b   : > { %v1933_v29 = vadd.f32 %v1932_v53, %v1851_v22  ;;  %v2033_v22 = vld [vmem:[%s4332_s5 + $0x108] sm:$0xff]  ;;  %v2654_v53 = vpack.c.bf16 %v2030_v28, %v2028_v26  ;;  %v2176_v28 = vld [vmem:[%s4334_s7 + $0x50] sm:$0xff] }
 0x63c   : > { %v1941_v25 = vmax.f32 %v4000_v34, 0.0  ;;  %v2166_v34 = vld [vmem:[%s4334_s7] sm:$0xff] }
 0x63d   : > { %v1942_v62 = vmax.f32 %v1933_v29, 0.0  ;;  %v1936_v2 = vpop.f32.mrb[8].mxu0  ;;  %v2656_v29 = vpack.c.bf16 %v2035_v24, %v2033_v22  ;;  %v2177_v22 = vld [vmem:[%s4334_s7 + $0x58] sm:$0xff] }
 0x63e   : > { %v4003_v4 = vadd.f32 %v1936_v2, %v1856_v11  ;;  %v1938_v6 = vpop.f32.mrb[9].mxu0  ;;  %1960 = vrot.lane.b32.xlu1 %v1941_v25, %s4371_s18  ;;  %v2037_v2 = vld [vmem:[%s4332_s5 + $0x128] sm:$0xff]  ;;  %v2688_v24 = vpack.c.bf16 %v2177_v22, %v2176_v28 }
 0x63f   : > { %1946 = vst.msk [vmem:[#allocation6 + $0x8] sm:$0xff] %vm1556_vm5, %v1942_v62  ;;  %v1939_v15 = vadd.f32 %v1938_v6, %v1856_v11  ;;  %v2032_v11 = vld [vmem:[%s4332_s5 + $0x100] sm:$0xff]  ;;  %v2034_v62 = vld [vmem:[%s4332_s5 + $0x110] sm:$0xff]  ;;  %v2039_v6 = vld [vmem:[%s4332_s5 + $0x138] sm:$0xff] }
 0x640   : > { %1950 = vst.msk [vmem:[#allocation6 + $0x8] sm:$0xff] %vm1949_vm3, %v2882_v7  ;;  %v1943_v18 = vmax.f32 %v4003_v4, 0.0 }
 0x641   : > { %v1944_v56 = vmax.f32 %v1939_v15, 0.0  ;;  %v2658_v15 = vpack.c.bf16 %v2034_v62, %v2032_v11  ;;  %v2180_v62 = vld [vmem:[%s4334_s7 + $0x70] sm:$0xff] }
 0x642   : > { %1964 = vrot.lane.b32.xlu1 %v1943_v18, %s4371_s18 }
 0x643   : > { %1948 = vst.msk [vmem:[#allocation6 + $0x18] sm:$0xff] %vm1556_vm5, %v1944_v56  ;;  %v2660_v56 = vpack.c.bf16 %v2039_v6, %v2037_v2  ;;  %v2181_v2 = vld [vmem:[%s4334_s7 + $0x78] sm:$0xff] }
 0x644   : > { %1951 = vst.msk [vmem:[#allocation6 + $0x18] sm:$0xff] %vm1949_vm3, %v2882_v7  ;;  %v2630_v7 = vpack.c.bf16 %v2006_v13, %v2004_v12  ;;  %v2047_v12 = vld [vmem:[%s4332_s5 + $0x178] sm:$0xff]  ;;  %v2666_v13 = vpack.c.bf16 %v2042_v9, %v2040_v1  ;;  %v2694_v6 = vpack.c.bf16 %v2181_v2, %v2180_v62  ;;  %v2141_v1 = vld [vmem:[%s4333_s6 + $0x8] sm:$0xff]  ;;  %v2140_v9 = vld [vmem:[%s4333_s6] sm:$0xff] }
 0x645   : > { %v2668_v14 = vpack.c.bf16 %v2047_v12, %v2045_v10  ;;  %v2142_v10 = vld [vmem:[%s4333_s6 + $0x10] sm:$0xff] }
 0x646   : > { %2631 = vmatpush1.bf16.msra.mxu1 %v2630_v7  ;;  %v2046_v7 = vld [vmem:[%s4332_s5 + $0x170] sm:$0xff] }
 0x647   : > { %v4048_v19 = vld [vmem:[#allocation6 + $0x8] sm:$0xff]  ;;  %2633 = vmatprep.subr.bf16.mxu1 %v2632_v20  ;;  %v2670_v20 = vpack.c.bf16 %v2046_v7, %v2044_v17 }
 0x648   : > { %1962 = vrot.lane.b32.xlu0 %v4048_v19, %s4371_s18 }
 0x64a   : > { %2635 = vmatpush1.bf16.msra.mxu1 %v2634_v0 }
 0x64b   : > { %v4064_v5 = vld [vmem:[#allocation6 + $0x18] sm:$0xff]  ;;  %2637 = vmatprep.subr.bf16.mxu1 %v2636_v8 }
 0x64c   : > { %1966 = vrot.lane.b32.xlu0 %v4064_v5, %s4371_s18 }
 0x64e   : > { %2639 = vmatpush1.bf16.msra.mxu1 %v2638_v37 }
 0x64f   : > { %2641 = vmatprep.subr.bf16.mxu1 %v2640_v39 }
 0x652   : > { %2643 = vmatpush1.bf16.msra.mxu1 %v2642_v43 }
 0x653   : > { %2645 = vmatprep.subr.bf16.mxu1 %v2644_v44 }
 0x656   : > { %2647 = vmatpush1.bf16.msra.mxu1 %v2646_v49  ;;  %v2170_v49 = vld [vmem:[%s4334_s7 + $0x20] sm:$0xff] }
 0x657   : > { %2649 = vmatprep.subr.bf16.mxu1 %v2648_v50  ;;  %v2171_v50 = vld [vmem:[%s4334_s7 + $0x28] sm:$0xff] }
 0x658   : > { %v2679_v3 = vpack.c.bf16 %v2171_v50, %v2170_v49 }
 0x65a   : > { %2651 = vmatpush1.bf16.msra.mxu1 %v2650_v51  ;;  %v2174_v51 = vld [vmem:[%s4334_s7 + $0x40] sm:$0xff] }
 0x65b   : > { %2653 = vmatprep.subr.bf16.mxu1 %v2652_v52  ;;  %v2175_v52 = vld [vmem:[%s4334_s7 + $0x48] sm:$0xff] }
 0x65c   : > { %v2685_v26 = vpack.c.bf16 %v2175_v52, %v2174_v51 }
 0x65e   : > { %2655 = vmatpush1.bf16.msra.mxu1 %v2654_v53  ;;  %v2178_v53 = vld [vmem:[%s4334_s7 + $0x60] sm:$0xff] }
 0x65f   : > { %2657 = vmatprep.subr.bf16.mxu1 %v2656_v29  ;;  %v2179_v29 = vld [vmem:[%s4334_s7 + $0x68] sm:$0xff] }
 0x660   : > { %v2691_v11 = vpack.c.bf16 %v2179_v29, %v2178_v53 }
 0x662   : > { %2659 = vmatpush1.bf16.msra.mxu1 %v2658_v15  ;;  %v2182_v15 = vld [vmem:[%s4334_s7 + $0x80] sm:$0xff] }
 0x663   : > { %2661 = vmatprep.subr.bf16.mxu1 %v2660_v56  ;;  %v2183_v56 = vld [vmem:[%s4334_s7 + $0x88] sm:$0xff] }
 0x664   : > { %v2697_v57 = vpack.c.bf16 %v2183_v56, %v2182_v15 }
 0x666   : > { %2663 = vmatpush1.bf16.msra.mxu1 %v2662_v61 }
 0x667   : > { %2665 = vmatprep.subr.bf16.mxu1 %v2664_v63 }
 0x66a   : > { %2667 = vmatpush1.bf16.msra.mxu1 %v2666_v13 }
 0x66b   : > { %2669 = vmatprep.subr.bf16.mxu1 %v2668_v14 }
 0x66e   : > { %2671 = vmatpush1.bf16.msra.mxu1 %v2670_v20 }
 0x66f   : > { %2372 = vmatprep.subr.msk.mxu1 %vm2056_vm4, %v2049_v21 }
 0x672   : > { %2373 = vmatpush1.msk.msra.mxu1 %vm2056_vm4, %v2048_v23 }
 0x673   : > { %2672 = vmatprep.subr.bf16.mxu1 %v2885_v54 }
 0x6b0   : > { %v1961_v27 = vpop.permute.xlu1 %1960 }
 0x6b4   : > { %v1965_v33 = vpop.permute.xlu1 %1964 }
 0x6ba   : > { %v1963_v31 = vpop.permute.xlu0 %1962 }
 0x6bb   : > { %v1968_v0 = vsel %vm436_vm9, %v1961_v27, %v1963_v31  ;;  %v1975_v8 = vmax.f32 %v4048_v19, %v1963_v31 }
 0x6bc   : > { %v1974_v16 = vmax.f32 %v1941_v25, %v1968_v0  ;;  %v2167_v25 = vld [vmem:[%s4334_s7 + $0x8] sm:$0xff] }
 0x6bd   : > { %1984 = vrot.lane.b32.xlu0 %v1975_v8, %s2890_s0  ;;  %v2673_v41 = vpack.c.bf16 %v2167_v25, %v2166_v34 }
 0x6be   : > { %1982 = vrot.lane.b32.xlu1 %v1974_v16, %s2890_s0  ;;  %v1967_v35 = vpop.permute.xlu0 %1966 }
 0x6bf   : > { %v1969_v36 = vsel %vm436_vm9, %v1965_v33, %v1967_v35  ;;  %v1977_v37 = vmax.f32 %v4064_v5, %v1967_v35  ;;  %vm2155_vm9 = vcmask 261120  }
 0x6c0   : > { %v1976_v39 = vmax.f32 %v1943_v18, %v1969_v36  ;;  %v2168_v18 = vld [vmem:[%s4334_s7 + $0x10] sm:$0xff] }
 0x6c1   : > { %1988 = vrot.lane.b32.xlu0 %v1977_v37, %s2890_s0  ;;  %v2676_v47 = vpack.c.bf16 %v2169_v42, %v2168_v18 }
 0x6c2   : > { %1986 = vrot.lane.b32.xlu1 %v1976_v39, %s2890_s0 }
 0x72f   : > { %v1985_v19 = vpop.permute.xlu0 %1984 }
 0x730   : > { %v1997_v40 = vmax.f32 %v1975_v8, %v1985_v19  ;;  %v1983_v38 = vpop.permute.xlu1 %1982 }
 0x731   : > { %v1990_v5 = vsel %vm1653_vm0, %v1983_v38, %v1985_v19  ;;  %v2165_v38 = vld [vmem:[%s4335_s8] sm:$0x1] }
 0x732   : > { %v1996_v4 = vmax.f32 %v1974_v16, %v1990_v5  ;;  %2374 = vmatprep.mubr.msk.f32.mxu1 %vm1556_vm5, %v1997_v40 }
 0x733   : > { %v1989_v43 = vpop.permute.xlu0 %1988 }
 0x734   : > { %v1999_v44 = vmax.f32 %v1977_v37, %v1989_v43  ;;  %v1987_v45 = vpop.permute.xlu1 %1986  ;;  %2128 = vmatmul.mubr.f32.vlgmr.msra.gmra.mrb[6].mxu1 %v1996_v4 }
 0x735   : > { %v1991_v46 = vsel %vm1653_vm0, %v1987_v45, %v1989_v43  ;;  %2674 = vmatpush1.bf16.msra.mxu1 %v2673_v41 }
 0x736   : > { %v1998_v48 = vmax.f32 %v1976_v39, %v1991_v46  ;;  %2375 = vmatprep.mubr.msk.f32.mxu1 %vm1556_vm5, %v1999_v44  ;;  %2675 = vmatprep.subr.bf16.mxu1 %v2885_v54 }
 0x738   : > { %2134 = vmatmul.mubr.f32.gmra.mrb[8].mxu1 %v1998_v48 }
 0x739   : > { %2677 = vmatpush1.bf16.msra.mxu1 %v2676_v47 }
 0x73a   : > { %2678 = vmatprep.subr.bf16.mxu1 %v2885_v54 }
 0x73d   : > { %2680 = vmatpush1.bf16.msra.mxu1 %v2679_v3 }
 0x73e   : > { %2681 = vmatprep.subr.bf16.mxu1 %v2885_v54 }
 0x741   : > { %2683 = vmatpush1.bf16.msra.mxu1 %v2682_v55 }
 0x742   : > { %2684 = vmatprep.subr.bf16.mxu1 %v2885_v54 }
 0x745   : > { %2686 = vmatpush1.bf16.msra.mxu1 %v2685_v26 }
 0x746   : > { %2687 = vmatprep.subr.bf16.mxu1 %v2885_v54 }
 0x749   : > { %2689 = vmatpush1.bf16.msra.mxu1 %v2688_v24 }
 0x74a   : > { %2690 = vmatprep.subr.bf16.mxu1 %v2885_v54 }
 0x74d   : > { %2692 = vmatpush1.bf16.msra.mxu1 %v2691_v11 }
 0x74e   : > { %2693 = vmatprep.subr.bf16.mxu1 %v2885_v54 }
 0x751   : > { %2695 = vmatpush1.bf16.msra.mxu1 %v2694_v6 }
 0x752   : > { %2696 = vmatprep.subr.bf16.mxu1 %v2885_v54 }
 0x755   : > { %2698 = vmatpush1.bf16.msra.mxu1 %v2697_v57 }
 0x756   : > { %2699 = vmatprep.subr.bf16.mxu1 %v2885_v54  ;;  %v2143_v54 = vld [vmem:[%s4333_s6 + $0x18] sm:$0xff] }
 0x759   : > { %2701 = vmatpush1.bf16.msra.mxu1 %v2700_v60 }
 0x807   : > { %v2129_v61 = vpop.f32.mrb[6].mxu1 }
 0x808   : > { %v2131_v63 = vpop.f32.mrb[7].mxu1  ;;  %v2144_v14 = vmul.f32 %v2140_v9, %v2129_v61 }
 0x809   : > { %v2145_v12 = vmul.f32 %v2141_v1, %v2131_v63 }
 0x80b   : > { %v2135_v13 = vpop.f32.mrb[8].mxu1  ;;  %v2156_v23 = vsel %vm2155_vm9, %v2145_v12, 0.0 }
 0x80c   : > { %v2146_v17 = vmul.f32 %v2142_v10, %v2135_v13  ;;  %v2137_v7 = vpop.f32.mrb[9].mxu1 }
 0x80d   : > { %v2147_v20 = vmul.f32 %v2143_v54, %v2137_v7 }
 0x80e   : > { %v2148_v21 = vadd.f32 %v2146_v17, %v2144_v14 }
 0x80f   : > { %v2157_v27 = vsel %vm2155_vm9, %v2147_v20, 0.0 }
 0x810   : > { %v2149_v31 = vrot.slane %v2148_v21, 4  ;;  %v2158_v0 = vadd.f32 %v2157_v27, %v2156_v23 }
 0x812   : > { %v2150_v8 = vadd.f32 %v2149_v31, %v2148_v21  ;;  %v2159_v16 = vrot.slane %v2158_v0, 4 }
 0x814   : > { %v2151_v33 = vrot.slane %v2150_v8, 2  ;;  %v2160_v35 = vadd.f32 %v2159_v16, %v2158_v0 }
 0x816   : > { %v2152_v36 = vadd.f32 %v2151_v33, %v2150_v8  ;;  %v2161_v37 = vrot.slane %v2160_v35, 2 }
 0x818   : > { %v2162_v39 = vadd.f32 %v2161_v37, %v2160_v35  ;;  %v2153_v34 = vrot.slane %v2152_v36, 1 }
 0x81a   : > { %v2163_v25 = vrot.slane %v2162_v39, 1  ;;  %v2154_v40 = vadd.f32 %v2153_v34, %v2152_v36 }
 0x81c   : > { %v2164_v19 = vadd.f32 %v2163_v25, %v2162_v39 }
 0x81e   : > { %2376 = vmatprep.mubr.msk.f32.mxu1 %vm2155_vm9, %v2164_v19 }
 0x81f   : > { %2254 = vmatmul.mubr.f32.vlgmr.msra.gmra.mrb[10].mxu1 %v2154_v40 }
 0x8f2   : > { %v2255_v5 = vpop.f32.mrb[10].mxu1 }
 0x8f3   : > { %v2259_v41 = vadd.f32 %v2255_v5, %v2165_v38  ;;  %v2257_v4 = vpop.f32.mrb[11].mxu1 }
 0x8f5   : > { %2261 = vst.msk [vmem:[%s403_s29] sm:$0x1] %vm2260_vm10, %v2259_v41 }
 0x8f6   : > { %2815 = shalt.err (!%p2812_p3)
}
 0x8f7   : > { %s2816_s23 = scalar_lea.hbm %s4285_s17, 16  ;;  %s2820_s29 = scalar_lea.hbm %s4339_s12, 32 }
 0x8f8   : > { %p2817_p4 = scmp.ne.s32.totalorder %s4285_s17, %s2816_s23  ;;  %p2821_p9 = scmp.lt.u32.totalorder %s4285_s17, %s4339_s12 }
 0x8f9   : > { %p2822_p10 = scmp.lt.u32.totalorder %s2820_s29, %s2816_s23  ;;  %p2824_p12 = scmp.lt.u32.totalorder %s2816_s23, %s4285_s17 }
 0x8fa   : > { %p2818_p7 = pnand %p2817_p4, %p2997_p5 }
 0x8fb   : > { %p2823_p11 = por %p2822_p10, %p2821_p9 }
 0x8fc   : > { %p2819_p8 = pneg %p2818_p7 }
 0x8fd   : > { %p2825_p13 = por %p2824_p12, %p2823_p11 }
 0x8ff   : > { %p2826_p0 = pnand %p2825_p13, %p2819_p8 }
 0x901   : > { %2829 = shalt.err (!%p2826_p0)
}
 0x902   : > { %2709 = dma.vmem_to_hbm [thread:$0]  (%p2997_p5), %s4287_s19, 16, %s4285_s17, %s2263_s15  }
 0x903 PF: > { %p2715_p1 = scmp.ge.s32.totalorder %s2864_s24, 2  ;;  %s2287_s20 = sand.u32 1, %s2852_s21  }
 0x904   : > { %s2288_s25 = scalar_lea.sflag [#allocation8], %s2287_s20 }
 0x905   : > { %p2712_p2 = pnand %p2715_p1, %p3001_p6 }
 0x907   : > { %2847 = dma.done.wait (!%p2712_p2), %s2288_s25, 16  }
 0x908   : > { %2849 = vsyncadd (!%p2712_p2), %s2288_s25, 4294967280  ;;  %s4381_s30 = sld [smem:[#allocation10_spill]]  ;;  %s4382_s23 = sld [smem:[#allocation11_spill]] }
 0x909   : > { %p22_p3 = scmp.ge.s32.totalorder %s2984_s27, 4   ;;  %s4383_s21 = smov %s2856_s22 }
 0x90a   : > { %s4385_s24 = smov %s2984_s27 }
 0x90b   :  { %24 = sbr.rel (!%p22_p3) target bundleno = 5 (0x5), region = 127 }
 0x90e   : > { %s4384_s22 = smov %s4381_s30 }
 0x912   :  { %2292 = vsyncpa [#allocation8], 1 }
 0x913   :  { %2294 = vsyncpa [#allocation8 + $0x1], 1 }

</bundles_post_ra>
